<compile_context>
chip_gen: v7x
topology: tpu7x:2x2x1
jax: 0.10.0
libtpu: 0.0.40
codegen_flags: <defaults>
</compile_context>

<pallas_src>
import functools

import jax
import jax.numpy as jnp
from jax import lax
from jax.experimental import pallas as pl
from jax.experimental.pallas import tpu as pltpu


def _conv_stats_kernel(x_ref, w_ref, conv_ref, stats_ref, *, H, W, Cout):
    """Per-image 3x3 conv (9 tap matmuls) + per-image BN partial statistics.

    x_ref    : (1, (H+2)*W + 2, Cin) f32  H-padded rows flattened over (h, w),
                                          plus one zero guard row top/bottom.
    w_ref    : (9, Cin, Cout)        bf16 tap-major conv weights (resident).
    conv_ref : (1, H*W, Cout)        f32  conv output for this image.
    stats_ref: (1, 2, Cout)          f32  [channel sum, centered sum of squares].
    """
    HW = H * W

    # W-boundary masks on the flattened row index m = h*W + w.
    m = lax.broadcasted_iota(jnp.int32, (HW, 1), 0)
    if W & (W - 1) == 0:
        w_col = m & (W - 1)
    else:
        w_col = m % W
    not_left_edge = w_col != 0           # needed by dx == 0 taps
    not_right_edge = w_col != W - 1      # needed by dx == 2 taps

    acc = jnp.zeros((HW, Cout), jnp.float32)
    for dy in range(3):
        for dx in range(3):
            # Overlapping sublane view: rows [dy*W + dx, dy*W + dx + H*W).
            lhs = x_ref[0, pl.ds(dy * W + dx, HW), :]            # (HW, Cin) f32
            if dx == 0:
                lhs = jnp.where(not_left_edge, lhs, 0.0)
            elif dx == 2:
                lhs = jnp.where(not_right_edge, lhs, 0.0)
            acc = acc + jnp.dot(lhs.astype(jnp.bfloat16),
                                w_ref[dy * 3 + dx],
                                preferred_element_type=jnp.float32)

    conv_ref[0] = acc

    # Per-image, per-channel moments centered at the per-image mean so the
    # cross-image combine in phase 2 never forms E[x^2] - mean^2 directly.
    s1 = jnp.sum(acc, axis=0, keepdims=True)                     # (1, Cout)
    mu = s1 * (1.0 / HW)
    d = acc - mu
    s2c = jnp.sum(d * d, axis=0, keepdims=True)                  # (1, Cout)
    stats_ref[0] = jnp.concatenate([s1, s2c], axis=0)            # (2, Cout)


def _bn_relu_kernel(stats_ref, y_ref, g_ref, b_ref, o_ref, *, W, per, count, eps):
    """Combine per-image stats -> batch mean/var, apply affine + ReLU.

    stats_ref: (N, 2, Cout)  f32  phase-1 partial stats (resident, tiny).
    y_ref    : (H, W*Cout)   f32  lane-dense conv rows for this image block.
    g_ref    : (1, W*Cout)   f32  gamma tiled over the W lane groups.
    b_ref    : (1, W*Cout)   f32  beta  tiled over the W lane groups.
    o_ref    : (H, W*Cout)        fused BN+ReLU output (full-lane stores).
    """
    st = stats_ref[...]                                          # (N, 2, C)
    s1 = st[:, 0:1, :]                                           # (N, 1, C)
    s2c = st[:, 1:2, :]                                          # (N, 1, C)

    mean = jnp.sum(s1, axis=0) * (1.0 / count)                   # (1, C)
    mu_i = s1 * (1.0 / per)                                      # (N, 1, C)
    d = mu_i - mean                                              # (N, 1, C)
    var = (jnp.sum(s2c, axis=0)
           + per * jnp.sum(d * d, axis=0)) * (1.0 / count)       # (1, C) biased
    inv_std = lax.rsqrt(var + eps)                               # (1, C)

    # Replicate the per-channel stats across the W lane groups (lane concat).
    mean_t = jnp.concatenate([mean] * W, axis=-1)                # (1, W*C)
    inv_t = jnp.concatenate([inv_std] * W, axis=-1)              # (1, W*C)

    scale = inv_t * g_ref[...]
    offset = b_ref[...] - mean_t * scale
    o_ref[...] = jnp.maximum(y_ref[...] * scale + offset, 0.0).astype(o_ref.dtype)


@functools.partial(jax.jit, static_argnames=("eps",))
def conv_bn_relu(x_nchw, w_oihw, bias, gamma, beta, *, eps=1e-5):
    """Fused Conv2d(3x3, s=1, p=1) + BatchNorm2d(train) + ReLU. NCHW in/out."""
    N, Cin, H, W = x_nchw.shape
    Cout = w_oihw.shape[0]
    HW = H * W
    PR = (H + 2) * W + 2                 # padded + guard rows per image
    del bias  # Exactly cancelled by the BN mean subtraction.
    # TODO(synk): BatchNorm running_mean/running_var buffers are not updated
    # (training-mode forward activation only, matching the module's forward).

    # ---- Activation: NHWC rows flattened over (h, w); pad H plus one guard
    # row each side so every tap is an in-bounds contiguous sublane slice.
    x_nhwc = jnp.transpose(x_nchw, (0, 2, 3, 1))                 # (N, H, W, Cin)
    x_rows = x_nhwc.reshape(N, HW, Cin)
    x_pad = jnp.pad(x_rows, ((0, 0), (W + 1, W + 1), (0, 0)))    # (N, PR, Cin)

    # ---- Weights: tap-major (9, Cin, Cout), bf16 for the MXU.
    w9 = jnp.transpose(w_oihw, (2, 3, 1, 0)).reshape(9, Cin, Cout)
    w9 = w9.astype(jnp.bfloat16)

    # ---- BN affine params pre-tiled to the (w, c) lane layout of phase 2.
    gamma_t = jnp.tile(gamma.astype(jnp.float32), W).reshape(1, W * Cout)
    beta_t = jnp.tile(beta.astype(jnp.float32), W).reshape(1, W * Cout)

    # ---- Phase 1: conv (9 dense tap matmuls) + per-image partial BN stats.
    conv_cost = pl.CostEstimate(
        flops=2 * N * HW * 9 * Cin * Cout,
        transcendentals=0,
        bytes_accessed=(x_pad.size * 4 + w9.size * 2
                        + N * HW * Cout * 4 + N * 2 * Cout * 4))
    conv_flat, stats = pl.pallas_call(
        functools.partial(_conv_stats_kernel, H=H, W=W, Cout=Cout),
        grid=(N,),
        in_specs=[
            pl.BlockSpec((1, PR, Cin), lambda n: (n, 0, 0)),
            pl.BlockSpec((9, Cin, Cout), lambda n: (0, 0, 0)),   # resident
        ],
        out_specs=[
            pl.BlockSpec((1, HW, Cout), lambda n: (n, 0, 0)),
            pl.BlockSpec((1, 2, Cout), lambda n: (n, 0, 0)),
        ],
        out_shape=[
            jax.ShapeDtypeStruct((N, HW, Cout), jnp.float32),
            jax.ShapeDtypeStruct((N, 2, Cout), jnp.float32),
        ],
        compiler_params=pltpu.CompilerParams(
            dimension_semantics=("parallel",),
            vmem_limit_bytes=32 * 1024 * 1024),  # explicit budget (v7x: 64 MiB phys)
        cost_estimate=conv_cost,
    )(x_pad, w9)

    # ---- Phase 2: combine stats, affine + ReLU on a lane-dense layout.
    # (N, H*W, Cout) -> (N*H, W*Cout) is a free row-major reshape.
    y2 = conv_flat.reshape(N * H, W * Cout)
    bn_cost = pl.CostEstimate(
        flops=6 * N * HW * Cout,
        transcendentals=N * Cout,
        bytes_accessed=2 * N * HW * Cout * 4 + N * 2 * Cout * 4 + 2 * W * Cout * 4)
    out2d = pl.pallas_call(
        functools.partial(_bn_relu_kernel, W=W, per=HW, count=N * HW, eps=eps),
        grid=(N,),
        in_specs=[
            pl.BlockSpec((N, 2, Cout), lambda n: (0, 0, 0)),     # resident
            pl.BlockSpec((H, W * Cout), lambda n: (n, 0)),
            pl.BlockSpec((1, W * Cout), lambda n: (0, 0)),
            pl.BlockSpec((1, W * Cout), lambda n: (0, 0)),
        ],
        out_specs=pl.BlockSpec((H, W * Cout), lambda n: (n, 0)),
        out_shape=jax.ShapeDtypeStruct((N * H, W * Cout), x_nchw.dtype),
        compiler_params=pltpu.CompilerParams(
            dimension_semantics=("parallel",),
            vmem_limit_bytes=32 * 1024 * 1024),
        cost_estimate=bn_cost,
    )(stats, y2, gamma_t, beta_t)

    out = out2d.reshape(N, H, W, Cout)
    return jnp.transpose(out, (0, 3, 1, 2))                      # -> NCHW


def _reference(x_nchw, w_oihw, bias, gamma, beta, eps=1e-5):
    conv = lax.conv_general_dilated(
        x_nchw, w_oihw, window_strides=(1, 1), padding="SAME",
        dimension_numbers=("NCHW", "OIHW", "NCHW"))
    conv = conv + bias[None, :, None, None]
    mean = jnp.mean(conv, axis=(0, 2, 3), keepdims=True)
    var = jnp.mean((conv - mean) ** 2, axis=(0, 2, 3), keepdims=True)
    y = (conv - mean) * lax.rsqrt(var + eps)
    y = y * gamma[None, :, None, None] + beta[None, :, None, None]
    return jnp.maximum(y, 0.0)


if __name__ == "__main__":
    key = jax.random.PRNGKey(0)
    k_x, k_w, k_b, k_g, k_be = jax.random.split(key, 5)

    N, Cin, Cout, H, W = 2, 4, 8, 16, 16

    x = jax.random.normal(k_x, (N, Cin, H, W), dtype=jnp.float32)
    fan_in = Cin * 3 * 3
    bound = 1.0 / (fan_in ** 0.5)
    w = jax.random.uniform(k_w, (Cout, Cin, 3, 3), jnp.float32, -bound, bound)
    b = jax.random.uniform(k_b, (Cout,), jnp.float32, -bound, bound)
    gamma = 1.0 + 0.1 * jax.random.normal(k_g, (Cout,), jnp.float32)
    beta = 0.1 * jax.random.normal(k_be, (Cout,), jnp.float32)

    out = jax.block_until_ready(conv_bn_relu(x, w, b, gamma, beta))
    ref = jax.block_until_ready(_reference(x, w, b, gamma, beta))

    assert out.shape == (N, Cout, H, W)
    # bf16 MXU operands (f32 accumulation / f32 BN): tolerance loosened vs. the
    # pure-f32 reference, as anticipated by the perf review.
    err = float(jnp.max(jnp.abs(out - ref)))
    assert jnp.allclose(out, ref, atol=5e-2, rtol=5e-2), err
    print("KERNEL_OK")
</pallas_src>

<mosaic_0001>
module attributes {stable_mosaic.version = 11 : i64} {
  func.func @_conv_stats_kernel(%arg0: i32, %arg1: memref<1x290x4xf32, #tpu.memory_space<vmem>>, %arg2: memref<9x4x8xbf16, #tpu.memory_space<vmem>>, %arg3: memref<1x256x8xf32, #tpu.memory_space<vmem>>, %arg4: memref<1x2x8xf32, #tpu.memory_space<vmem>>) attributes {dimension_semantics = [#tpu.dimension_semantics<parallel>], iteration_bounds = array<i64: 2>, scalar_prefetch = 0 : i64, scratch_operands = 0 : i64, tpu.core_type = #tpu.core_type<tc>, window_params = [{transform_indices = @transform_0, window_bounds = array<i64: 1, 290, 4>}, {pipeline_mode = #tpu.pipeline_mode<synchronous>, transform_indices = @transform_1, window_bounds = array<i64: 9, 4, 8>}, {transform_indices = @transform_2, window_bounds = array<i64: 1, 256, 8>}, {transform_indices = @transform_3, window_bounds = array<i64: 1, 2, 8>}]} {
    %0 = tpu.iota {dimensions = array<i32: 0>} : vector<256x1xi32>
    %c15_i32 = arith.constant 15 : i32
    %1 = vector.broadcast %c15_i32 : i32 to vector<256x1xi32>
    %2 = arith.andi %0, %1 : vector<256x1xi32>
    %c0_i32 = arith.constant 0 : i32
    %3 = vector.broadcast %c0_i32 : i32 to vector<256x1xi32>
    %4 = arith.cmpi ne, %2, %3 : vector<256x1xi32>
    %c15_i32_0 = arith.constant 15 : i32
    %5 = vector.broadcast %c15_i32_0 : i32 to vector<256x1xi32>
    %6 = arith.cmpi ne, %2, %5 : vector<256x1xi32>
    %cst = arith.constant 0.000000e+00 : f32
    %7 = vector.broadcast %cst : f32 to vector<256x8xf32>
    %c0 = arith.constant 0 : index
    %c0_1 = arith.constant 0 : index
    %c0_2 = arith.constant 0 : index
    %8 = vector.load %arg1[%c0, %c0_1, %c0_2] : memref<1x290x4xf32, #tpu.memory_space<vmem>>, vector<1x256x4xf32>
    %9 = vector.shape_cast %8 : vector<1x256x4xf32> to vector<256x4xf32>
    %cst_3 = arith.constant 0.000000e+00 : f32
    %10 = vector.shape_cast %4 : vector<256x1xi1> to vector<256x1xi1>
    %11 = vector.broadcast %10 : vector<256x1xi1> to vector<256x4xi1>
    %12 = vector.broadcast %cst_3 : f32 to vector<256x4xf32>
    %13 = arith.select %11, %9, %12 : vector<256x4xi1>, vector<256x4xf32>
    %14 = arith.truncf %13 : vector<256x4xf32> to vector<256x4xbf16>
    %c0_4 = arith.constant 0 : index
    %c0_5 = arith.constant 0 : index
    %c0_6 = arith.constant 0 : index
    %15 = vector.load %arg2[%c0_4, %c0_5, %c0_6] : memref<9x4x8xbf16, #tpu.memory_space<vmem>>, vector<1x4x8xbf16>
    %16 = vector.shape_cast %15 : vector<1x4x8xbf16> to vector<4x8xbf16>
    %cst_7 = arith.constant dense<0.000000e+00> : vector<256x8xf32>
    %17 = tpu.matmul %14, %16, %cst_7 {dimension_numbers = #tpu.dot_dimension_numbers<[1], [0], [0], [1], [0, 0, 1, 1], [], []>} : vector<256x4xbf16>, vector<4x8xbf16>, vector<256x8xf32> -> vector<256x8xf32>
    %18 = arith.addf %7, %17 : vector<256x8xf32>
    %c0_8 = arith.constant 0 : index
    %c1 = arith.constant 1 : index
    %c0_9 = arith.constant 0 : index
    %19 = vector.load %arg1[%c0_8, %c1, %c0_9] : memref<1x290x4xf32, #tpu.memory_space<vmem>>, vector<1x256x4xf32>
    %20 = vector.shape_cast %19 : vector<1x256x4xf32> to vector<256x4xf32>
    %21 = arith.truncf %20 : vector<256x4xf32> to vector<256x4xbf16>
    %c1_10 = arith.constant 1 : index
    %c0_11 = arith.constant 0 : index
    %c0_12 = arith.constant 0 : index
    %22 = vector.load %arg2[%c1_10, %c0_11, %c0_12] : memref<9x4x8xbf16, #tpu.memory_space<vmem>>, vector<1x4x8xbf16>
    %23 = vector.shape_cast %22 : vector<1x4x8xbf16> to vector<4x8xbf16>
    %cst_13 = arith.constant dense<0.000000e+00> : vector<256x8xf32>
    %24 = tpu.matmul %21, %23, %cst_13 {dimension_numbers = #tpu.dot_dimension_numbers<[1], [0], [0], [1], [0, 0, 1, 1], [], []>} : vector<256x4xbf16>, vector<4x8xbf16>, vector<256x8xf32> -> vector<256x8xf32>
    %25 = arith.addf %18, %24 : vector<256x8xf32>
    %c0_14 = arith.constant 0 : index
    %c2 = arith.constant 2 : index
    %c0_15 = arith.constant 0 : index
    %26 = vector.load %arg1[%c0_14, %c2, %c0_15] : memref<1x290x4xf32, #tpu.memory_space<vmem>>, vector<1x256x4xf32>
    %27 = vector.shape_cast %26 : vector<1x256x4xf32> to vector<256x4xf32>
    %cst_16 = arith.constant 0.000000e+00 : f32
    %28 = vector.shape_cast %6 : vector<256x1xi1> to vector<256x1xi1>
    %29 = vector.broadcast %28 : vector<256x1xi1> to vector<256x4xi1>
    %30 = vector.broadcast %cst_16 : f32 to vector<256x4xf32>
    %31 = arith.select %29, %27, %30 : vector<256x4xi1>, vector<256x4xf32>
    %32 = arith.truncf %31 : vector<256x4xf32> to vector<256x4xbf16>
    %c2_17 = arith.constant 2 : index
    %c0_18 = arith.constant 0 : index
    %c0_19 = arith.constant 0 : index
    %33 = vector.load %arg2[%c2_17, %c0_18, %c0_19] : memref<9x4x8xbf16, #tpu.memory_space<vmem>>, vector<1x4x8xbf16>
    %34 = vector.shape_cast %33 : vector<1x4x8xbf16> to vector<4x8xbf16>
    %cst_20 = arith.constant dense<0.000000e+00> : vector<256x8xf32>
    %35 = tpu.matmul %32, %34, %cst_20 {dimension_numbers = #tpu.dot_dimension_numbers<[1], [0], [0], [1], [0, 0, 1, 1], [], []>} : vector<256x4xbf16>, vector<4x8xbf16>, vector<256x8xf32> -> vector<256x8xf32>
    %36 = arith.addf %25, %35 : vector<256x8xf32>
    %c0_21 = arith.constant 0 : index
    %c16 = arith.constant 16 : index
    %c0_22 = arith.constant 0 : index
    %37 = vector.load %arg1[%c0_21, %c16, %c0_22] : memref<1x290x4xf32, #tpu.memory_space<vmem>>, vector<1x256x4xf32>
    %38 = vector.shape_cast %37 : vector<1x256x4xf32> to vector<256x4xf32>
    %cst_23 = arith.constant 0.000000e+00 : f32
    %39 = vector.shape_cast %4 : vector<256x1xi1> to vector<256x1xi1>
    %40 = vector.broadcast %39 : vector<256x1xi1> to vector<256x4xi1>
    %41 = vector.broadcast %cst_23 : f32 to vector<256x4xf32>
    %42 = arith.select %40, %38, %41 : vector<256x4xi1>, vector<256x4xf32>
    %43 = arith.truncf %42 : vector<256x4xf32> to vector<256x4xbf16>
    %c3 = arith.constant 3 : index
    %c0_24 = arith.constant 0 : index
    %c0_25 = arith.constant 0 : index
    %44 = vector.load %arg2[%c3, %c0_24, %c0_25] : memref<9x4x8xbf16, #tpu.memory_space<vmem>>, vector<1x4x8xbf16>
    %45 = vector.shape_cast %44 : vector<1x4x8xbf16> to vector<4x8xbf16>
    %cst_26 = arith.constant dense<0.000000e+00> : vector<256x8xf32>
    %46 = tpu.matmul %43, %45, %cst_26 {dimension_numbers = #tpu.dot_dimension_numbers<[1], [0], [0], [1], [0, 0, 1, 1], [], []>} : vector<256x4xbf16>, vector<4x8xbf16>, vector<256x8xf32> -> vector<256x8xf32>
    %47 = arith.addf %36, %46 : vector<256x8xf32>
    %c0_27 = arith.constant 0 : index
    %c17 = arith.constant 17 : index
    %c0_28 = arith.constant 0 : index
    %48 = vector.load %arg1[%c0_27, %c17, %c0_28] : memref<1x290x4xf32, #tpu.memory_space<vmem>>, vector<1x256x4xf32>
    %49 = vector.shape_cast %48 : vector<1x256x4xf32> to vector<256x4xf32>
    %50 = arith.truncf %49 : vector<256x4xf32> to vector<256x4xbf16>
    %c4 = arith.constant 4 : index
    %c0_29 = arith.constant 0 : index
    %c0_30 = arith.constant 0 : index
    %51 = vector.load %arg2[%c4, %c0_29, %c0_30] : memref<9x4x8xbf16, #tpu.memory_space<vmem>>, vector<1x4x8xbf16>
    %52 = vector.shape_cast %51 : vector<1x4x8xbf16> to vector<4x8xbf16>
    %cst_31 = arith.constant dense<0.000000e+00> : vector<256x8xf32>
    %53 = tpu.matmul %50, %52, %cst_31 {dimension_numbers = #tpu.dot_dimension_numbers<[1], [0], [0], [1], [0, 0, 1, 1], [], []>} : vector<256x4xbf16>, vector<4x8xbf16>, vector<256x8xf32> -> vector<256x8xf32>
    %54 = arith.addf %47, %53 : vector<256x8xf32>
    %c0_32 = arith.constant 0 : index
    %c18 = arith.constant 18 : index
    %c0_33 = arith.constant 0 : index
    %55 = vector.load %arg1[%c0_32, %c18, %c0_33] : memref<1x290x4xf32, #tpu.memory_space<vmem>>, vector<1x256x4xf32>
    %56 = vector.shape_cast %55 : vector<1x256x4xf32> to vector<256x4xf32>
    %cst_34 = arith.constant 0.000000e+00 : f32
    %57 = vector.shape_cast %6 : vector<256x1xi1> to vector<256x1xi1>
    %58 = vector.broadcast %57 : vector<256x1xi1> to vector<256x4xi1>
    %59 = vector.broadcast %cst_34 : f32 to vector<256x4xf32>
    %60 = arith.select %58, %56, %59 : vector<256x4xi1>, vector<256x4xf32>
    %61 = arith.truncf %60 : vector<256x4xf32> to vector<256x4xbf16>
    %c5 = arith.constant 5 : index
    %c0_35 = arith.constant 0 : index
    %c0_36 = arith.constant 0 : index
    %62 = vector.load %arg2[%c5, %c0_35, %c0_36] : memref<9x4x8xbf16, #tpu.memory_space<vmem>>, vector<1x4x8xbf16>
    %63 = vector.shape_cast %62 : vector<1x4x8xbf16> to vector<4x8xbf16>
    %cst_37 = arith.constant dense<0.000000e+00> : vector<256x8xf32>
    %64 = tpu.matmul %61, %63, %cst_37 {dimension_numbers = #tpu.dot_dimension_numbers<[1], [0], [0], [1], [0, 0, 1, 1], [], []>} : vector<256x4xbf16>, vector<4x8xbf16>, vector<256x8xf32> -> vector<256x8xf32>
    %65 = arith.addf %54, %64 : vector<256x8xf32>
    %c0_38 = arith.constant 0 : index
    %c32 = arith.constant 32 : index
    %c0_39 = arith.constant 0 : index
    %66 = vector.load %arg1[%c0_38, %c32, %c0_39] : memref<1x290x4xf32, #tpu.memory_space<vmem>>, vector<1x256x4xf32>
    %67 = vector.shape_cast %66 : vector<1x256x4xf32> to vector<256x4xf32>
    %cst_40 = arith.constant 0.000000e+00 : f32
    %68 = vector.shape_cast %4 : vector<256x1xi1> to vector<256x1xi1>
    %69 = vector.broadcast %68 : vector<256x1xi1> to vector<256x4xi1>
    %70 = vector.broadcast %cst_40 : f32 to vector<256x4xf32>
    %71 = arith.select %69, %67, %70 : vector<256x4xi1>, vector<256x4xf32>
    %72 = arith.truncf %71 : vector<256x4xf32> to vector<256x4xbf16>
    %c6 = arith.constant 6 : index
    %c0_41 = arith.constant 0 : index
    %c0_42 = arith.constant 0 : index
    %73 = vector.load %arg2[%c6, %c0_41, %c0_42] : memref<9x4x8xbf16, #tpu.memory_space<vmem>>, vector<1x4x8xbf16>
    %74 = vector.shape_cast %73 : vector<1x4x8xbf16> to vector<4x8xbf16>
    %cst_43 = arith.constant dense<0.000000e+00> : vector<256x8xf32>
    %75 = tpu.matmul %72, %74, %cst_43 {dimension_numbers = #tpu.dot_dimension_numbers<[1], [0], [0], [1], [0, 0, 1, 1], [], []>} : vector<256x4xbf16>, vector<4x8xbf16>, vector<256x8xf32> -> vector<256x8xf32>
    %76 = arith.addf %65, %75 : vector<256x8xf32>
    %c0_44 = arith.constant 0 : index
    %c33 = arith.constant 33 : index
    %c0_45 = arith.constant 0 : index
    %77 = vector.load %arg1[%c0_44, %c33, %c0_45] : memref<1x290x4xf32, #tpu.memory_space<vmem>>, vector<1x256x4xf32>
    %78 = vector.shape_cast %77 : vector<1x256x4xf32> to vector<256x4xf32>
    %79 = arith.truncf %78 : vector<256x4xf32> to vector<256x4xbf16>
    %c7 = arith.constant 7 : index
    %c0_46 = arith.constant 0 : index
    %c0_47 = arith.constant 0 : index
    %80 = vector.load %arg2[%c7, %c0_46, %c0_47] : memref<9x4x8xbf16, #tpu.memory_space<vmem>>, vector<1x4x8xbf16>
    %81 = vector.shape_cast %80 : vector<1x4x8xbf16> to vector<4x8xbf16>
    %cst_48 = arith.constant dense<0.000000e+00> : vector<256x8xf32>
    %82 = tpu.matmul %79, %81, %cst_48 {dimension_numbers = #tpu.dot_dimension_numbers<[1], [0], [0], [1], [0, 0, 1, 1], [], []>} : vector<256x4xbf16>, vector<4x8xbf16>, vector<256x8xf32> -> vector<256x8xf32>
    %83 = arith.addf %76, %82 : vector<256x8xf32>
    %c0_49 = arith.constant 0 : index
    %c34 = arith.constant 34 : index
    %c0_50 = arith.constant 0 : index
    %84 = vector.load %arg1[%c0_49, %c34, %c0_50] : memref<1x290x4xf32, #tpu.memory_space<vmem>>, vector<1x256x4xf32>
    %85 = vector.shape_cast %84 : vector<1x256x4xf32> to vector<256x4xf32>
    %cst_51 = arith.constant 0.000000e+00 : f32
    %86 = vector.shape_cast %6 : vector<256x1xi1> to vector<256x1xi1>
    %87 = vector.broadcast %86 : vector<256x1xi1> to vector<256x4xi1>
    %88 = vector.broadcast %cst_51 : f32 to vector<256x4xf32>
    %89 = arith.select %87, %85, %88 : vector<256x4xi1>, vector<256x4xf32>
    %90 = arith.truncf %89 : vector<256x4xf32> to vector<256x4xbf16>
    %c8 = arith.constant 8 : index
    %c0_52 = arith.constant 0 : index
    %c0_53 = arith.constant 0 : index
    %91 = vector.load %arg2[%c8, %c0_52, %c0_53] : memref<9x4x8xbf16, #tpu.memory_space<vmem>>, vector<1x4x8xbf16>
    %92 = vector.shape_cast %91 : vector<1x4x8xbf16> to vector<4x8xbf16>
    %cst_54 = arith.constant dense<0.000000e+00> : vector<256x8xf32>
    %93 = tpu.matmul %90, %92, %cst_54 {dimension_numbers = #tpu.dot_dimension_numbers<[1], [0], [0], [1], [0, 0, 1, 1], [], []>} : vector<256x4xbf16>, vector<4x8xbf16>, vector<256x8xf32> -> vector<256x8xf32>
    %94 = arith.addf %83, %93 : vector<256x8xf32>
    %c0_55 = arith.constant 0 : index
    %c0_56 = arith.constant 0 : index
    %c0_57 = arith.constant 0 : index
    %95 = vector.load %arg3[%c0_55, %c0_56, %c0_57] : memref<1x256x8xf32, #tpu.memory_space<vmem>>, vector<1x256x8xf32>
    %96 = vector.shape_cast %95 : vector<1x256x8xf32> to vector<256x8xf32>
    %97 = vector.shape_cast %94 : vector<256x8xf32> to vector<1x256x8xf32>
    tpu.vector_store %arg3[%c0_55, %c0_56, %c0_57], %97 {strides = array<i32>} : memref<1x256x8xf32, #tpu.memory_space<vmem>>, vector<1x256x8xf32>,
    %cst_58 = arith.constant dense<0.000000e+00> : vector<8xf32>
    %98 = vector.multi_reduction <add>, %94, %cst_58 [0] : vector<256x8xf32> to vector<8xf32>
    %99 = vector.shape_cast %98 : vector<8xf32> to vector<1x8xf32>
    %cst_59 = arith.constant 3.906250e-03 : f32
    %100 = vector.broadcast %cst_59 : f32 to vector<1x8xf32>
    %101 = arith.mulf %99, %100 : vector<1x8xf32>
    %102 = vector.broadcast %101 : vector<1x8xf32> to vector<256x8xf32>
    %103 = arith.subf %94, %102 : vector<256x8xf32>
    %104 = arith.mulf %103, %103 : vector<256x8xf32>
    %cst_60 = arith.constant dense<0.000000e+00> : vector<8xf32>
    %105 = vector.multi_reduction <add>, %104, %cst_60 [0] : vector<256x8xf32> to vector<8xf32>
    %106 = vector.shape_cast %105 : vector<8xf32> to vector<1x8xf32>
    %107 = tpu.concatenate %99, %106 in 0 : vector<1x8xf32>, vector<1x8xf32> -> vector<2x8xf32>
    %c0_61 = arith.constant 0 : index
    %c0_62 = arith.constant 0 : index
    %c0_63 = arith.constant 0 : index
    %108 = vector.load %arg4[%c0_61, %c0_62, %c0_63] : memref<1x2x8xf32, #tpu.memory_space<vmem>>, vector<1x2x8xf32>
    %109 = vector.shape_cast %108 : vector<1x2x8xf32> to vector<2x8xf32>
    %110 = vector.shape_cast %107 : vector<2x8xf32> to vector<1x2x8xf32>
    tpu.vector_store %arg4[%c0_61, %c0_62, %c0_63], %110 {strides = array<i32>} : memref<1x2x8xf32, #tpu.memory_space<vmem>>, vector<1x2x8xf32>,
    return
  }
  func.func @transform_0(%arg0: i32) -> (i32, i32, i32) {
    %c0_i32 = arith.constant 0 : i32
    %c0_i32_0 = arith.constant 0 : i32
    %c0_i32_1 = arith.constant 0 : i32
    return %arg0, %c0_i32, %c0_i32_0 : i32, i32, i32
  }
  func.func @transform_1(%arg0: i32) -> (i32, i32, i32) {
    %c0_i32 = arith.constant 0 : i32
    %c0_i32_0 = arith.constant 0 : i32
    %c0_i32_1 = arith.constant 0 : i32
    %c0_i32_2 = arith.constant 0 : i32
    return %c0_i32, %c0_i32_0, %c0_i32_1 : i32, i32, i32
  }
  func.func @transform_2(%arg0: i32) -> (i32, i32, i32) {
    %c0_i32 = arith.constant 0 : i32
    %c0_i32_0 = arith.constant 0 : i32
    %c0_i32_1 = arith.constant 0 : i32
    return %arg0, %c0_i32, %c0_i32_0 : i32, i32, i32
  }
  func.func @transform_3(%arg0: i32) -> (i32, i32, i32) {
    %c0_i32 = arith.constant 0 : i32
    %c0_i32_0 = arith.constant 0 : i32
    %c0_i32_1 = arith.constant 0 : i32
    return %arg0, %c0_i32, %c0_i32_0 : i32, i32, i32
  }
}

module attributes {stable_mosaic.version = 11 : i64} {
  func.func @_bn_relu_kernel(%arg0: i32, %arg1: memref<2x2x8xf32, #tpu.memory_space<vmem>>, %arg2: memref<16x128xf32, #tpu.memory_space<vmem>>, %arg3: memref<1x128xf32, #tpu.memory_space<vmem>>, %arg4: memref<1x128xf32, #tpu.memory_space<vmem>>, %arg5: memref<16x128xf32, #tpu.memory_space<vmem>>) attributes {dimension_semantics = [#tpu.dimension_semantics<parallel>], iteration_bounds = array<i64: 2>, scalar_prefetch = 0 : i64, scratch_operands = 0 : i64, tpu.core_type = #tpu.core_type<tc>, window_params = [{pipeline_mode = #tpu.pipeline_mode<synchronous>, transform_indices = @transform_0, window_bounds = array<i64: 2, 2, 8>}, {transform_indices = @transform_1, window_bounds = array<i64: 16, 128>}, {pipeline_mode = #tpu.pipeline_mode<synchronous>, transform_indices = @transform_2, window_bounds = array<i64: 1, 128>}, {pipeline_mode = #tpu.pipeline_mode<synchronous>, transform_indices = @transform_3, window_bounds = array<i64: 1, 128>}, {transform_indices = @transform_4, window_bounds = array<i64: 16, 128>}]} {
    %c0 = arith.constant 0 : index
    %c0_0 = arith.constant 0 : index
    %c0_1 = arith.constant 0 : index
    %0 = vector.load %arg1[%c0, %c0_0, %c0_1] : memref<2x2x8xf32, #tpu.memory_space<vmem>>, vector<2x2x8xf32>
    %1 = vector.extract_strided_slice %0 {offsets = [0, 0, 0], sizes = [2, 1, 8], strides = [1, 1, 1]} : vector<2x2x8xf32> to vector<2x1x8xf32>
    %2 = vector.extract_strided_slice %0 {offsets = [0, 1, 0], sizes = [2, 1, 8], strides = [1, 1, 1]} : vector<2x2x8xf32> to vector<2x1x8xf32>
    %cst = arith.constant dense<0.000000e+00> : vector<1x8xf32>
    %3 = vector.multi_reduction <add>, %1, %cst [0] : vector<2x1x8xf32> to vector<1x8xf32>
    %cst_2 = arith.constant 0.001953125 : f32
    %4 = vector.broadcast %cst_2 : f32 to vector<1x8xf32>
    %5 = arith.mulf %3, %4 : vector<1x8xf32>
    %cst_3 = arith.constant 3.906250e-03 : f32
    %6 = vector.broadcast %cst_3 : f32 to vector<2x1x8xf32>
    %7 = arith.mulf %1, %6 : vector<2x1x8xf32>
    %8 = vector.shape_cast %5 : vector<1x8xf32> to vector<1x1x8xf32>
    %9 = vector.broadcast %8 : vector<1x1x8xf32> to vector<2x1x8xf32>
    %10 = arith.subf %7, %9 : vector<2x1x8xf32>
    %cst_4 = arith.constant dense<0.000000e+00> : vector<1x8xf32>
    %11 = vector.multi_reduction <add>, %2, %cst_4 [0] : vector<2x1x8xf32> to vector<1x8xf32>
    %12 = arith.mulf %10, %10 : vector<2x1x8xf32>
    %cst_5 = arith.constant dense<0.000000e+00> : vector<1x8xf32>
    %13 = vector.multi_reduction <add>, %12, %cst_5 [0] : vector<2x1x8xf32> to vector<1x8xf32>
    %cst_6 = arith.constant 2.560000e+02 : f32
    %14 = vector.broadcast %cst_6 : f32 to vector<1x8xf32>
    %15 = arith.mulf %14, %13 : vector<1x8xf32>
    %16 = arith.addf %11, %15 : vector<1x8xf32>
    %cst_7 = arith.constant 0.001953125 : f32
    %17 = vector.broadcast %cst_7 : f32 to vector<1x8xf32>
    %18 = arith.mulf %16, %17 : vector<1x8xf32>
    %cst_8 = arith.constant 9.99999974E-6 : f32
    %19 = vector.broadcast %cst_8 : f32 to vector<1x8xf32>
    %20 = arith.addf %18, %19 : vector<1x8xf32>
    %21 = math.rsqrt %20 : vector<1x8xf32>
    %22 = tpu.concatenate %5, %5, %5, %5, %5, %5, %5, %5, %5, %5, %5, %5, %5, %5, %5, %5 in 1 : vector<1x8xf32>, vector<1x8xf32>, vector<1x8xf32>, vector<1x8xf32>, vector<1x8xf32>, vector<1x8xf32>, vector<1x8xf32>, vector<1x8xf32>, vector<1x8xf32>, vector<1x8xf32>, vector<1x8xf32>, vector<1x8xf32>, vector<1x8xf32>, vector<1x8xf32>, vector<1x8xf32>, vector<1x8xf32> -> vector<1x128xf32>
    %23 = tpu.concatenate %21, %21, %21, %21, %21, %21, %21, %21, %21, %21, %21, %21, %21, %21, %21, %21 in 1 : vector<1x8xf32>, vector<1x8xf32>, vector<1x8xf32>, vector<1x8xf32>, vector<1x8xf32>, vector<1x8xf32>, vector<1x8xf32>, vector<1x8xf32>, vector<1x8xf32>, vector<1x8xf32>, vector<1x8xf32>, vector<1x8xf32>, vector<1x8xf32>, vector<1x8xf32>, vector<1x8xf32>, vector<1x8xf32> -> vector<1x128xf32>
    %c0_9 = arith.constant 0 : index
    %c0_10 = arith.constant 0 : index
    %24 = vector.load %arg3[%c0_9, %c0_10] : memref<1x128xf32, #tpu.memory_space<vmem>>, vector<1x128xf32>
    %25 = arith.mulf %23, %24 : vector<1x128xf32>
    %c0_11 = arith.constant 0 : index
    %c0_12 = arith.constant 0 : index
    %26 = vector.load %arg4[%c0_11, %c0_12] : memref<1x128xf32, #tpu.memory_space<vmem>>, vector<1x128xf32>
    %27 = arith.mulf %22, %25 : vector<1x128xf32>
    %28 = arith.subf %26, %27 : vector<1x128xf32>
    %c0_13 = arith.constant 0 : index
    %c0_14 = arith.constant 0 : index
    %29 = vector.load %arg2[%c0_13, %c0_14] : memref<16x128xf32, #tpu.memory_space<vmem>>, vector<16x128xf32>
    %30 = vector.broadcast %25 : vector<1x128xf32> to vector<16x128xf32>
    %31 = arith.mulf %29, %30 : vector<16x128xf32>
    %32 = vector.broadcast %28 : vector<1x128xf32> to vector<16x128xf32>
    %33 = arith.addf %31, %32 : vector<16x128xf32>
    %cst_15 = arith.constant 0.000000e+00 : f32
    %34 = vector.broadcast %cst_15 : f32 to vector<16x128xf32>
    %35 = arith.maximumf %33, %34 : vector<16x128xf32>
    %c0_16 = arith.constant 0 : index
    %c0_17 = arith.constant 0 : index
    %36 = vector.load %arg5[%c0_16, %c0_17] : memref<16x128xf32, #tpu.memory_space<vmem>>, vector<16x128xf32>
    tpu.vector_store %arg5[%c0_16, %c0_17], %35 {strides = array<i32>} : memref<16x128xf32, #tpu.memory_space<vmem>>, vector<16x128xf32>,
    return
  }
  func.func @transform_0(%arg0: i32) -> (i32, i32, i32) {
    %c0_i32 = arith.constant 0 : i32
    %c0_i32_0 = arith.constant 0 : i32
    %c0_i32_1 = arith.constant 0 : i32
    %c0_i32_2 = arith.constant 0 : i32
    return %c0_i32, %c0_i32_0, %c0_i32_1 : i32, i32, i32
  }
  func.func @transform_1(%arg0: i32) -> (i32, i32) {
    %c0_i32 = arith.constant 0 : i32
    %c0_i32_0 = arith.constant 0 : i32
    return %arg0, %c0_i32 : i32, i32
  }
  func.func @transform_2(%arg0: i32) -> (i32, i32) {
    %c0_i32 = arith.constant 0 : i32
    %c0_i32_0 = arith.constant 0 : i32
    %c0_i32_1 = arith.constant 0 : i32
    return %c0_i32, %c0_i32_0 : i32, i32
  }
  func.func @transform_3(%arg0: i32) -> (i32, i32) {
    %c0_i32 = arith.constant 0 : i32
    %c0_i32_0 = arith.constant 0 : i32
    %c0_i32_1 = arith.constant 0 : i32
    return %c0_i32, %c0_i32_0 : i32, i32
  }
  func.func @transform_4(%arg0: i32) -> (i32, i32) {
    %c0_i32 = arith.constant 0 : i32
    %c0_i32_0 = arith.constant 0 : i32
    return %arg0, %c0_i32 : i32, i32
  }
}

</mosaic_0001>

<bundles_post_ra>
// kernel: tile.13
= control target key start
LH: loop header
LB: loop body
LE: loop exit
PB: predicated region body
PF: predicated region fallthrough
CT: control target
= control target key end

     0   :  { %s28_s0 = inlined_call_operand.vmem [shape: f32[8], index: 0, kind: input, shape index: {}]   ;;  %s29_s1 = inlined_call_operand.vmem [shape: f32[16,8], index: 1, kind: output, shape index: {}]  }
   0x1   :  { %v4_v0 = vld [vmem:[%s28_s0] ss:$0 sm:$0xff] }
   0x2   :  { %5 = vst [vmem:[%s29_s1] sm:$0xff] %v4_v0  ;;  %8 = vst [vmem:[%s29_s1 + $0x8] sm:$0xff] %v4_v0 }

// kernel: tile.14
= control target key start
LH: loop header
LB: loop body
LE: loop exit
PB: predicated region body
PF: predicated region fallthrough
CT: control target
= control target key end

     0   :  { %s131_s10 = smov 120   ;;  %s132_s11 = smov 104   ;;  %vm3_vm0 = vcmask 64512   ;;  %vm9_vm1 = vcmask 1048512   ;;  %vm15_vm2 = vcmask 982912   ;;  %vm21_vm3 = vcmask 917312   ;;  %s207_s0 = inlined_call_operand.vmem [shape: f32[16,8], index: 0, kind: input, shape index: {}]   ;;  %s208_s1 = inlined_call_operand.vmem [shape: f32[1,128], index: 1, kind: output, shape index: {}]  }
   0x1   :  { %v101_v0 = vld [vmem:[%s207_s0 + $0xf] sm:$0x1]   ;;  %v103_v1 = vld [vmem:[%s207_s0 + $0xd] sm:$0x1]   ;;  %v102_v2 = vld [vmem:[%s207_s0 + $0xe] sm:$0x1]  }
   0x2   :  { %7 = vrot.lane.b32.xlu0 %v101_v0, %s131_s10  ;;  %19 = vrot.lane.b32.xlu1 %v103_v1, %s132_s11  ;;  %v104_v3 = vld [vmem:[%s207_s0 + $0xc] sm:$0x1]   ;;  %s133_s16 = smov 112   ;;  %s134_s17 = smov 96   ;;  %v105_v4 = vld [vmem:[%s207_s0 + $0xb] sm:$0x1]  }
   0x3   :  { %v106_v5 = vld [vmem:[%s207_s0 + $0xa] sm:$0x1]   ;;  %v2_v6 = vld [vmem:[%s207_s0] sm:$0x1]   ;;  %s135_s24 = smov 88   ;;  %s136_s25 = smov 80  }
   0x4   :  { %4 = vst.msk [vmem:[#allocation0] sm:$0x1] %vm3_vm0, %v2_v6   ;;  %v107_v7 = vld [vmem:[%s207_s0 + $0x9] sm:$0x1]   ;;  %v108_v8 = vld [vmem:[%s207_s0 + $0x8] sm:$0x1]  }
   0x5   :  { %s137_s30 = smov 72   ;;  %s138_s2 = smov 64   ;;  %v109_v9 = vld [vmem:[%s207_s0 + $0x7] sm:$0x1]   ;;  %v110_v10 = vld [vmem:[%s207_s0 + $0x6] sm:$0x1]  }
   0x6   :  { %13 = vrot.lane.b32.xlu0 %v102_v2, %s133_s16  ;;  %25 = vrot.lane.b32.xlu1 %v104_v3, %s134_s17  ;;  %s139_s7 = smov 56   ;;  %s140_s8 = smov 48   ;;  %v111_v11 = vld [vmem:[%s207_s0 + $0x5] sm:$0x1]   ;;  %v112_v12 = vld [vmem:[%s207_s0 + $0x4] sm:$0x1]  }
   0x7   :  { %s141_s13 = smov 40   ;;  %s142_s14 = smov 32   ;;  %v113_v13 = vld [vmem:[%s207_s0 + $0x3] sm:$0x1]   ;;  %v114_v14 = vld [vmem:[%s207_s0 + $0x2] sm:$0x1]  }
   0x8   :  { %s143_s19 = smov 24   ;;  %s144_s20 = smov 16   ;;  %v115_v15 = vld [vmem:[%s207_s0 + $0x1] sm:$0x1]   ;;  %vm27_vm4 = vcmask 851712   ;;  %vm33_vm5 = vcmask 786112  }
   0x9   :  { %s145_s0 = smov 8   ;;  %vm39_vm6 = vcmask 720512   ;;  %vm45_vm7 = vcmask 654912   ;;  %vm51_vm8 = vcmask 589312   ;;  %vm57_vm9 = vcmask 523712  }
   0xa   :  { %31 = vrot.lane.b32.xlu0 %v105_v4, %s135_s24  ;;  %37 = vrot.lane.b32.xlu1 %v106_v5, %s136_s25  ;;  %vm63_vm10 = vcmask 458112   ;;  %vm69_vm11 = vcmask 392512   ;;  %vm75_vm12 = vcmask 326912   ;;  %vm81_vm13 = vcmask 261312  }
   0xb   :  { %vm87_vm14 = vcmask 195712   ;;  %vm93_vm15 = vcmask 130112  }
   0xe   :  { %43 = vrot.lane.b32.xlu0 %v107_v7, %s137_s30  ;;  %49 = vrot.lane.b32.xlu1 %v108_v8, %s138_s2 }
  0x12   :  { %55 = vrot.lane.b32.xlu0 %v109_v9, %s139_s7  ;;  %61 = vrot.lane.b32.xlu1 %v110_v10, %s140_s8 }
  0x16   :  { %67 = vrot.lane.b32.xlu0 %v111_v11, %s141_s13  ;;  %73 = vrot.lane.b32.xlu1 %v112_v12, %s142_s14 }
  0x1a   :  { %79 = vrot.lane.b32.xlu0 %v113_v13, %s143_s19  ;;  %85 = vrot.lane.b32.xlu1 %v114_v14, %s144_s20 }
  0x1e   :  { %91 = vrot.lane.b32.xlu0 %v115_v15, %s145_s0 }
  0x74   :  { %v8_v16 = vpop.permute.xlu0 %7   ;;  %v20_v17 = vpop.permute.xlu1 %19  }
  0x75   :  { %10 = vst.msk [vmem:[#allocation0] sm:$0x1] %vm9_vm1, %v8_v16  }
  0x78   :  { %v14_v18 = vpop.permute.xlu0 %13   ;;  %v26_v19 = vpop.permute.xlu1 %25  }
  0x79   :  { %16 = vst.msk [vmem:[#allocation0] sm:$0x1] %vm15_vm2, %v14_v18  }
  0x7a   :  { %22 = vst.msk [vmem:[#allocation0] sm:$0x1] %vm21_vm3, %v20_v17  }
  0x7b   :  { %28 = vst.msk [vmem:[#allocation0] sm:$0x1] %vm27_vm4, %v26_v19  }
  0x7c   :  { %v32_v20 = vpop.permute.xlu0 %31   ;;  %v38_v21 = vpop.permute.xlu1 %37  }
  0x7d   :  { %34 = vst.msk [vmem:[#allocation0] sm:$0x1] %vm33_vm5, %v32_v20  }
  0x7e   :  { %40 = vst.msk [vmem:[#allocation0] sm:$0x1] %vm39_vm6, %v38_v21  }
  0x80   :  { %v44_v22 = vpop.permute.xlu0 %43   ;;  %v50_v23 = vpop.permute.xlu1 %49  }
  0x81   :  { %46 = vst.msk [vmem:[#allocation0] sm:$0x1] %vm45_vm7, %v44_v22  }
  0x82   :  { %52 = vst.msk [vmem:[#allocation0] sm:$0x1] %vm51_vm8, %v50_v23  }
  0x84   :  { %v56_v24 = vpop.permute.xlu0 %55   ;;  %v62_v25 = vpop.permute.xlu1 %61  }
  0x85   :  { %58 = vst.msk [vmem:[#allocation0] sm:$0x1] %vm57_vm9, %v56_v24  }
  0x86   :  { %64 = vst.msk [vmem:[#allocation0] sm:$0x1] %vm63_vm10, %v62_v25  }
  0x88   :  { %v68_v26 = vpop.permute.xlu0 %67   ;;  %v74_v27 = vpop.permute.xlu1 %73  }
  0x89   :  { %70 = vst.msk [vmem:[#allocation0] sm:$0x1] %vm69_vm11, %v68_v26  }
  0x8a   :  { %76 = vst.msk [vmem:[#allocation0] sm:$0x1] %vm75_vm12, %v74_v27  }
  0x8c   :  { %v80_v28 = vpop.permute.xlu0 %79   ;;  %v86_v29 = vpop.permute.xlu1 %85  }
  0x8d   :  { %82 = vst.msk [vmem:[#allocation0] sm:$0x1] %vm81_vm13, %v80_v28  }
  0x8e   :  { %88 = vst.msk [vmem:[#allocation0] sm:$0x1] %vm87_vm14, %v86_v29  }
  0x90   :  { %v92_v30 = vpop.permute.xlu0 %91  }
  0x91   :  { %94 = vst.msk [vmem:[#allocation0] sm:$0x1] %vm93_vm15, %v92_v30  }
  0x98   :  { %v98_v31 = vld [vmem:[#allocation0] sm:$0x1] }
  0x99   :  { %100 = vst [vmem:[%s208_s1] sm:$0x1] %v98_v31 }

// kernel: conv_bn_relu.3
= control target key start
LH: loop header
LB: loop body
LE: loop exit
PB: predicated region body
PF: predicated region fallthrough
CT: control target
= control target key end

     0   :  { %s541_s15 = smov 0   ;;  %s619_s0 = inlined_call_operand.vmem [shape: f32[2,2,8], index: 0, kind: input, shape index: {}]   ;;  %s620_s1 = inlined_call_operand.vmem [shape: f32[32,128], index: 1, kind: input, shape index: {}]   ;;  %s621_s2 = inlined_call_operand.vmem [shape: f32[1,128], index: 2, kind: input, shape index: {}]   ;;  %s622_s3 = inlined_call_operand.vmem [shape: f32[1,128], index: 3, kind: input, shape index: {}]   ;;  %s623_s4 = inlined_call_operand.vmem [shape: f32[32,128], index: 4, kind: output, shape index: {}]  }
   0x1 LB: > { %s456_s16 = sadd.s32 4294967295, %s499_s15   ;;  %p460_p0 = scmp.ge.s32.totalorder %s499_s15, 1  ;;  %s499_s15 = sphi %s541_s15, %s14_s15  }
   0x2   : > { %p163_p1 = scmp.lt.s32.totalorder %s499_s15, 3 }
   0x4   : > { %p164_p2 = pnand %p460_p0, %p163_p1 }
   0x5   : > { %v201_v0 = vld [vmem:[%s619_s0] sm:$0x3] (!%p164_p2)  ;;  %v202_v1 = vld [vmem:[%s619_s0 + $0x2] sm:$0x3] (!%p164_p2)  ;;  %vm203_vm0 = vcmask (!%p164_p2), 57344   ;;  %s501_s21 = smov (!%p164_p2), 8  }
   0x6   : > { %167 = sbr.rel (%p164_p2) target bundleno = 222 (0xde), region = 36  ;;  %v204_v2 = vsel (!%p164_p2), %vm203_vm0, %v201_v0, 0.0  ;;  %v205_v3 = vsel (!%p164_p2), %vm203_vm0, %v202_v1, 0.0  ;;  %v208_v5 = vmul.f32 (!%p164_p2), 0.00390625, %v201_v0  ;;  %v209_v6 = vmul.f32 (!%p164_p2), 0.00390625, %v202_v1  ;;  %s502_s22 = smov (!%p164_p2), 16  }
   0x7   : > { %v206_v4 = vadd.f32 (!%p164_p2), %v205_v3, %v204_v2  ;;  %vm212_vm1 = vcmask (!%p164_p2), 58369   ;;  %s503_s23 = smov (!%p164_p2), 24   ;;  %s504_s24 = smov (!%p164_p2), 32   ;;  %vm275_vm2 = vcmask (!%p164_p2), 64512   ;;  %vm277_vm3 = vcmask (!%p164_p2), 130048  }
   0x8   : > { %v213_v12 = vsel (!%p164_p2), %vm212_vm1, %v201_v0, 0.0  ;;  %v214_v13 = vsel (!%p164_p2), %vm212_vm1, %v202_v1, 0.0  ;;  %s505_s25 = smov (!%p164_p2), 40   ;;  %s506_s26 = smov (!%p164_p2), 48   ;;  %vm279_vm4 = vcmask (!%p164_p2), 195584   ;;  %vm281_vm5 = vcmask (!%p164_p2), 261120  }
   0x9   : > { %v557_v7 = vmul.f32 (!%p164_p2), 0.001953125, %v206_v4  ;;  %v215_v17 = vadd.f32 (!%p164_p2), %v214_v13, %v213_v12  ;;  %s507_s27 = smov (!%p164_p2), 56   ;;  %s508_s28 = smov (!%p164_p2), 64   ;;  %vm283_vm6 = vcmask (!%p164_p2), 326656   ;;  %vm285_vm7 = vcmask (!%p164_p2), 392192  }
   0xa   : > { %s509_s29 = smov (!%p164_p2), 72   ;;  %s510_s30 = smov (!%p164_p2), 80   ;;  %vm287_vm8 = vcmask (!%p164_p2), 457728   ;;  %vm289_vm9 = vcmask (!%p164_p2), 523264   ;;  %vm291_vm10 = vcmask (!%p164_p2), 588800   ;;  %vm293_vm11 = vcmask (!%p164_p2), 654336  }
   0xb   : > { %230 = vrot.lane.b32.xlu0 (!%p164_p2), %v557_v7, %s501_s21  ;;  %v210_v8 = vsub.f32 (!%p164_p2), %v208_v5, %v557_v7  ;;  %v211_v9 = vsub.f32 (!%p164_p2), %v209_v6, %v557_v7  ;;  %s511_s5 = smov (!%p164_p2), 88   ;;  %s512_s6 = smov (!%p164_p2), 96   ;;  %vm295_vm12 = vcmask (!%p164_p2), 719872   ;;  %vm299_vm13 = vcmask (!%p164_p2), 850944  }
   0xc   : > { %s513_s7 = smov (!%p164_p2), 112   ;;  %s514_s8 = smov (!%p164_p2), 104   ;;  %vm297_vm14 = vcmask (!%p164_p2), 785408   ;;  %vm301_vm15 = vcmask (!%p164_p2), 916480   ;;  %v382_v3 = vlaneseq (!%p164_p2) }
   0xd   : > { %v216_v10 = vmul.f32 %v210_v8, %v210_v8  ;;  %v217_v11 = vmul.f32 %v211_v9, %v211_v9  ;;  %s515_s9 = smov 120   ;;  %s461_s10 = sshll.u32 %s456_s16, 1 }
   0xe   : > { %p190_p3 = scmp.lt.s32.totalorder %s461_s10, 3 }
   0xf   : > { %v218_v14 = vsel %vm203_vm0, %v216_v10, 0.0  ;;  %v219_v15 = vsel %vm203_vm0, %v217_v11, 0.0  ;;  %233 = vrot.lane.b32.xlu0 %v557_v7, %s502_s22  ;;  %vm303_vm0 = vcmask 982016   ;;  %v465_v11 = vld [vmem:[%s621_s2] ss:$0 sm:$0xff] }
  0x10   : > { %v220_v16 = vadd.f32 %v219_v15, %v218_v14  ;;  %s625_s10 = smov (!%p190_p3, %s461_s10), 3  ;;  %v383_v14 = vshrl.u32 %v382_v3, 7 }
  0x11   : > { %s462_s13 = sshll.u32 %s625_s10, 3 }
  0x12   : > { %v221_v18 = vmul.f32 256.0, %v220_v16  ;;  %s193_s17 = scalar_lea.vmem %s620_s1, %s462_s13 }
  0x13   : > { %236 = vrot.lane.b32.xlu0 %v557_v7, %s503_s23 }
  0x14   : > { %v223_v19 = vrot.slane %v221_v18, 7 }
  0x16   : > { %v225_v20 = vadd.f32 %v223_v19, %v215_v17 }
  0x17   : > { %239 = vrot.lane.b32.xlu0 %v557_v7, %s504_s24 }
  0x18   : > { %v226_v21 = vmul.f32 0.001953125, %v225_v20 }
  0x1a   : > { %v227_v22 = vadd.f32 1e-05, %v226_v21  ;;  %v384_v21 = vsub.s32 1, %v383_v14 }
  0x1b   : > { %242 = vrot.lane.b32.xlu0 %v557_v7, %s505_s25 }
  0x1c   : > { %491 = vrsqrt.f32 %v227_v22 }
  0x1f   : > { %245 = vrot.lane.b32.xlu0 %v557_v7, %s506_s26 }
  0x23   : > { %248 = vrot.lane.b32.xlu0 %v557_v7, %s507_s27 }
  0x26   : > { %v492_v23 = vpop.eup %491 }
  0x27   : > { %312 = vrot.lane.b32.xlu1 %v492_v23, %s503_s23  ;;  %306 = vrot.lane.b32.xlu0 %v492_v23, %s501_s21 }
  0x2b   : > { %315 = vrot.lane.b32.xlu1 %v492_v23, %s504_s24  ;;  %309 = vrot.lane.b32.xlu0 %v492_v23, %s502_s22  ;;  %s199_s22 = scalar_lea.vmem %s623_s4, %s462_s13 }
  0x2f   : > { %318 = vrot.lane.b32.xlu1 %v492_v23, %s505_s25  ;;  %251 = vrot.lane.b32.xlu0 %v557_v7, %s508_s28 }
  0x33   : > { %321 = vrot.lane.b32.xlu1 %v492_v23, %s506_s26  ;;  %254 = vrot.lane.b32.xlu0 %v557_v7, %s509_s29 }
  0x37   : > { %324 = vrot.lane.b32.xlu1 %v492_v23, %s507_s27  ;;  %257 = vrot.lane.b32.xlu0 %v557_v7, %s510_s30 }
  0x3b   : > { %327 = vrot.lane.b32.xlu1 %v492_v23, %s508_s28  ;;  %260 = vrot.lane.b32.xlu0 %v557_v7, %s511_s5 }
  0x3f   : > { %330 = vrot.lane.b32.xlu1 %v492_v23, %s509_s29  ;;  %263 = vrot.lane.b32.xlu0 %v557_v7, %s512_s6 }
  0x43   : > { %333 = vrot.lane.b32.xlu1 %v492_v23, %s510_s30  ;;  %269 = vrot.lane.b32.xlu0 %v557_v7, %s513_s7 }
  0x47   : > { %336 = vrot.lane.b32.xlu1 %v492_v23, %s511_s5 }
  0x4b   : > { %339 = vrot.lane.b32.xlu1 %v492_v23, %s512_s6 }
  0x4f   : > { %342 = vrot.lane.b32.xlu1 %v492_v23, %s514_s8 }
  0x53   : > { %345 = vrot.lane.b32.xlu1 %v492_v23, %s513_s7 }
  0x57   : > { %348 = vrot.lane.b32.xlu1 %v492_v23, %s515_s9 }
  0x5b   : > { %266 = vrot.lane.b32.xlu1 %v557_v7, %s514_s8 }
  0x5f   : > { %272 = vrot.lane.b32.xlu1 %v557_v7, %s515_s9 }
  0x7d   : > { %v231_v24 = vpop.permute.xlu0 %230 }
  0x7e   : > { %v276_v43 = vsel %vm275_vm2, %v557_v7, %v231_v24 }
  0x81   : > { %v234_v25 = vpop.permute.xlu0 %233 }
  0x82   : > { %v278_v46 = vsel %vm277_vm3, %v276_v43, %v234_v25  ;;  %v374_v25 = vld [vmem:[%s622_s3] sm:$0x1] }
  0x85   : > { %v237_v26 = vpop.permute.xlu0 %236 }
  0x86   : > { %v280_v49 = vsel %vm279_vm4, %v278_v46, %v237_v26 }
  0x89   : > { %v240_v27 = vpop.permute.xlu0 %239 }
  0x8a   : > { %v282_v53 = vsel %vm281_vm5, %v280_v49, %v240_v27 }
  0x8d   : > { %v243_v28 = vpop.permute.xlu0 %242 }
  0x8e   : > { %v284_v57 = vsel %vm283_vm6, %v282_v53, %v243_v28  ;;  %v391_v28 = vsub.s32 0, %v383_v14 }
  0x91   : > { %v246_v30 = vpop.permute.xlu0 %245 }
  0x92   : > { %v286_v62 = vsel %vm285_vm7, %v284_v57, %v246_v30  ;;  %v380_v30 = vld [vmem:[%s193_s17] sm:$0xff] }
  0x95   : > { %v249_v32 = vpop.permute.xlu0 %248 }
  0x96   : > { %v288_v4 = vsel %vm287_vm8, %v286_v62, %v249_v32 }
  0x99   : > { %v313_v29 = vpop.permute.xlu1 %312  ;;  %v307_v35 = vpop.permute.xlu0 %306 }
  0x9a   : > { %v351_v41 = vsel %vm275_vm2, %v492_v23, %v307_v35 }
  0x9d   : > { %v316_v31 = vpop.permute.xlu1 %315  ;;  %v310_v37 = vpop.permute.xlu0 %309 }
  0x9e   : > { %v352_v44 = vsel %vm277_vm3, %v351_v41, %v310_v37 }
  0x9f   : > { %v353_v48 = vsel %vm279_vm4, %v352_v44, %v313_v29 }
  0xa0   : > { %v354_v50 = vsel %vm281_vm5, %v353_v48, %v316_v31  ;;  %v381_v31 = vld [vmem:[%s193_s17 + $0x8] sm:$0xff] }
  0xa1   : > { %v319_v33 = vpop.permute.xlu1 %318  ;;  %v252_v40 = vpop.permute.xlu0 %251 }
  0xa2   : > { %v355_v54 = vsel %vm283_vm6, %v354_v50, %v319_v33  ;;  %v290_v6 = vsel %vm289_vm9, %v288_v4, %v252_v40 }
  0xa5   : > { %v322_v34 = vpop.permute.xlu1 %321  ;;  %v255_v45 = vpop.permute.xlu0 %254 }
  0xa6   : > { %v356_v55 = vsel %vm285_vm7, %v355_v54, %v322_v34  ;;  %v292_v9 = vsel %vm291_vm10, %v290_v6, %v255_v45 }
  0xa9   : > { %v325_v36 = vpop.permute.xlu1 %324  ;;  %v258_v52 = vpop.permute.xlu0 %257 }
  0xaa   : > { %v357_v58 = vsel %vm287_vm8, %v356_v55, %v325_v36  ;;  %v294_v13 = vsel %vm293_vm11, %v292_v9, %v258_v52 }
  0xad   : > { %v328_v38 = vpop.permute.xlu1 %327  ;;  %v261_v60 = vpop.permute.xlu0 %260 }
  0xae   : > { %v358_v59 = vsel %vm289_vm9, %v357_v58, %v328_v38  ;;  %v296_v15 = vsel %vm295_vm12, %v294_v13, %v261_v60 }
  0xb1   : > { %v331_v39 = vpop.permute.xlu1 %330  ;;  %v264_v10 = vpop.permute.xlu0 %263 }
  0xb2   : > { %v359_v61 = vsel %vm291_vm10, %v358_v59, %v331_v39  ;;  %v298_v16 = vsel %vm297_vm14, %v296_v15, %v264_v10 }
  0xb5   : > { %v334_v42 = vpop.permute.xlu1 %333  ;;  %v270_v20 = vpop.permute.xlu0 %269 }
  0xb6   : > { %v360_v63 = vsel %vm293_vm11, %v359_v61, %v334_v42 }
  0xb9   : > { %v337_v47 = vpop.permute.xlu1 %336 }
  0xba   : > { %v361_v1 = vsel %vm295_vm12, %v360_v63, %v337_v47 }
  0xbd   : > { %v340_v51 = vpop.permute.xlu1 %339 }
  0xbe   : > { %v362_v2 = vsel %vm297_vm14, %v361_v1, %v340_v51 }
  0xc1   : > { %v343_v56 = vpop.permute.xlu1 %342 }
  0xc2   : > { %v363_v5 = vsel %vm299_vm13, %v362_v2, %v343_v56 }
  0xc5   : > { %v346_v0 = vpop.permute.xlu1 %345 }
  0xc6   : > { %v364_v7 = vsel %vm301_vm15, %v363_v5, %v346_v0 }
  0xc9   : > { %v349_v8 = vpop.permute.xlu1 %348 }
  0xca   : > { %v365_v12 = vsel %vm303_vm0, %v364_v7, %v349_v8 }
  0xcb   : > { %v373_v17 = vmul.f32 %v465_v11, %v365_v12 }
  0xcd   : > { %v267_v18 = vpop.permute.xlu1 %266  ;;  %v376_v24 = vrot.slane %v373_v17, 1  ;;  %v385_v27 = vrot.slane %v373_v17, %v384_v21 }
  0xce   : > { %v300_v19 = vsel %vm299_vm13, %v298_v16, %v267_v18 }
  0xcf   : > { %v302_v22 = vsel %vm301_vm15, %v300_v19, %v270_v20  ;;  %v386_v33 = vmul.f32 %v385_v27, %v380_v30  ;;  %v387_v34 = vmul.f32 %v385_v27, %v381_v31 }
  0xd1   : > { %v273_v23 = vpop.permute.xlu1 %272 }
  0xd2   : > { %v304_v26 = vsel %vm303_vm0, %v302_v22, %v273_v23 }
  0xd3   : > { %v378_v29 = vmul.f32 %v376_v24, %v304_v26 }
  0xd5   : > { %v379_v32 = vsub.f32 %v374_v25, %v378_v29 }
  0xd7   : > { %v392_v35 = vrot.slane %v379_v32, %v391_v28 }
  0xd9   : > { %v394_v36 = vadd.f32 %v392_v35, %v386_v33  ;;  %v395_v37 = vadd.f32 %v392_v35, %v387_v34 }
  0xdb   : > { %v396_v38 = vmax.f32 %v394_v36, 0.0  ;;  %v397_v39 = vmax.f32 %v395_v37, 0.0 }
  0xdd   : > { %398 = vst [vmem:[%s199_s22] sm:$0xff] %v396_v38  ;;  %399 = vst [vmem:[%s199_s22 + $0x8] sm:$0xff] %v397_v39 }
  0xde PF: > { %s14_s15 = sadd.s32 1, %s499_s15  }
  0xdf   : > { %p11_p4 = scmp.ge.s32.totalorder %s14_s15, 4  }
  0xe1   :  { %13 = sbr.rel (!%p11_p4) target bundleno = 1 (0x1), region = 66 }

// kernel: conv_bn_relu.2
= control target key start
LH: loop header
LB: loop body
LE: loop exit
PB: predicated region body
PF: predicated region fallthrough
CT: control target
= control target key end

     0   :  { %s4469_s12 = smov 0   ;;  %s5920_s0 = inlined_call_operand.vmem [shape: f32[2,290,4], index: 0, kind: input, shape index: {}]   ;;  %s5921_s1 = inlined_call_operand.vmem [shape: bf16[9,4,8], index: 1, kind: input, shape index: {}]   ;;  %s5922_s2 = inlined_call_operand.vmem [shape: f32[2,256,8], index: 2, kind: output, shape index: {0}]   ;;  %s5923_s3 = inlined_call_operand.vmem [shape: f32[2,2,8], index: 3, kind: output, shape index: {1}]  }
   0x1 LB: > { %s3541_s13 = sadd.s32 4294967295, %s4447_s12   ;;  %p3545_p0 = scmp.ge.s32.totalorder %s4447_s12, 1  ;;  %s4447_s12 = sphi %s4469_s12, %s14_s12  }
   0x2   : > { %p140_p1 = scmp.lt.s32.totalorder %s4447_s12, 3 }
   0x4   : > { %p141_p2 = pnand %p3545_p0, %p140_p1 }
   0x6   : > { %144 = sbr.rel (%p141_p2) target bundleno = 623 (0x26f), region = 28 }
   0xd   : > { %v3550_v0 = vld [vmem:[%s5921_s1 + $0x2] sm:$0x3]  ;;  %vm5927_vm0 = vcmask 1041408   ;;  %v4483_v1 = vld [vmem:[%s5921_s1 + $0x8] sm:$0x3]  ;;  %p168_p3 = scmp.lt.s32.totalorder %s3541_s13, 1  ;;  %v183_v20 = vlaneseq }
   0xe   : > { %4422 = vmatprep.subr.msk.bf16.mxu1 %vm5927_vm0, %v3550_v0  ;;  %4426 = vmatprep.subr.msk.bf16.mxu0 %vm5927_vm0, %v4483_v1  ;;  %v558_v2 = vsel %vm5927_vm0, %v3550_v0, 0  ;;  %v4491_v3 = vsel %vm5927_vm0, %v4483_v1, 0  ;;  %v456_v4 = vld [vmem:[%s5921_s1] sm:$0x3]  ;;  %v3634_v5 = vld [vmem:[%s5921_s1 + $0xa] sm:$0x3] }
   0xf   : > { %5978 = vst [vmem:[#allocation2_spill] sm:$0xff] %v4491_v3  ;;  %3859 = vmatpush3.bf16.msra.mxu1 %v558_v2  ;;  %3995 = vmatpush3.bf16.msra.mxu0 %v4491_v3  ;;  %s6246_s13 = smov (!%p168_p3, %s3541_s13), 1  ;;  %vm5929_vm1 = vcmask 31744   ;;  %v770_v14 = vsel %vm5927_vm0, %v456_v4, 0  ;;  %v2074_v18 = vsel %vm5927_vm0, %v3634_v5, 0  ;;  %v4549_v27 = vshrl.u32 %v183_v20, 7 }
  0x10   : > { %4423 = vmatprep.subr.msk.bf16.mxu1 %vm5927_vm0, %v456_v4  ;;  %4428 = vmatprep.subr.msk.bf16.mxu0 %vm5927_vm0, %v3634_v5  ;;  %s4432_s22 = smul.u32 296, %s6246_s13  ;;  %v4530_v21 = vld [vmem:[%s5921_s1 + $0xc] sm:$0x3]  ;;  %v4537_v22 = vld [vmem:[%s5921_s1 + $0x4] sm:$0x3]  ;;  %v5983_v50 = vmov 0 }
  0x11   : > { %v185_v30 = vadd.s32 8, %v4549_v27  ;;  %v187_v38 = vadd.s32 24, %v4549_v27  ;;  %v189_v41 = vadd.s32 40, %v4549_v27  ;;  %v191_v52 = vadd.s32 56, %v4549_v27  ;;  %s3704_s9 = sshll.u32 %s6246_s13, 8  ;;  %s3549_s15 = sshll.u32 %s6246_s13, 1 }
  0x12   : > { %s4508_s25 = scalar_lea.vmem %s5920_s0, %s4432_s22  ;;  %v5986_v53 = vmov 0  ;;  %v193_v55 = vadd.s32 72, %v4549_v27  ;;  %s5581_s14 = scalar_lea.vmem %s5922_s2, %s3704_s9 }
  0x13   : > { %v457_v6 = vld [vmem:[%s4508_s25 + $0x1] sm:$0xff]  ;;  %v458_v7 = vld [vmem:[%s4508_s25 + $0x9] sm:$0xff]  ;;  %v1649_v8 = vld [vmem:[%s4508_s25 + $0x11] sm:$0xff]  ;;  %v217_v35 = vand.u32 15, %v185_v30  ;;  %v219_v46 = vand.u32 15, %v187_v38  ;;  %v221_v47 = vand.u32 15, %v189_v41  ;;  %s181_s18 = scalar_lea.vmem %s5923_s3, %s3549_s15 }
  0x14   : > { %v489_v9 = vpack.c.bf16 %v458_v7, %v457_v6  ;;  %v1650_v10 = vld [vmem:[%s4508_s25 + $0x19] sm:$0xff]  ;;  %v1651_v11 = vld [vmem:[%s4508_s25 + $0x21] sm:$0xff]  ;;  %v1652_v12 = vld [vmem:[%s4508_s25 + $0x29] sm:$0xff]  ;;  %v223_v0 = vand.u32 15, %v191_v52  ;;  %v225_v4 = vand.u32 15, %v193_v55  ;;  %v216_v38 = vand.u32 15, %v4549_v27 }
  0x15   : > { %v1681_v13 = vpack.c.bf16 %v1650_v10, %v1649_v8  ;;  %v4517_v15 = vpack.c.bf16 %v1652_v12, %v1651_v11  ;;  %v1653_v16 = vld [vmem:[%s4508_s25 + $0x31] sm:$0xff]  ;;  %v1654_v17 = vld [vmem:[%s4508_s25 + $0x39] sm:$0xff]  ;;  %v1655_v23 = vld [vmem:[%s4508_s25 + $0x41] sm:$0xff]  ;;  %vm4577_vm2 = vcmp.ne.s32.totalorder %v217_v35, 15  ;;  %vm4602_vm3 = vcmp.ne.s32.totalorder %v219_v46, 15 }
  0x16   : > { %3860 = vmatprep.mubr.msk.bf16.mxu1 %vm5929_vm1, %v489_v9  ;;  %v4523_v19 = vpack.c.bf16 %v1654_v17, %v1653_v16  ;;  %v1656_v24 = vld [vmem:[%s4508_s25 + $0x49] sm:$0xff]  ;;  %v1657_v25 = vld [vmem:[%s4508_s25 + $0x51] sm:$0xff]  ;;  %v1658_v26 = vld [vmem:[%s4508_s25 + $0x59] sm:$0xff]  ;;  %v5984_v50 = vsel %vm4602_vm3, 4294967295, %v5983_v50  ;;  %vm4612_vm4 = vcmp.ne.s32.totalorder %v221_v47, 15  ;;  %v195_v8 = vadd.s32 88, %v4549_v27 }
  0x17   : > { %3996 = vmatprep.mubr.msk.bf16.mxu0 %vm5929_vm1, %v1681_v13  ;;  %3861 = vmatmul.mubr.msk.bf16.vlgmr.msra.gmra.mrb[0].mxu1 %vm5929_vm1, %v1681_v13  ;;  %v4553_v28 = vpack.c.bf16 %v1656_v24, %v1655_v23  ;;  %v4555_v29 = vpack.c.bf16 %v1658_v26, %v1657_v25  ;;  %v1659_v31 = vld [vmem:[%s4508_s25 + $0x61] sm:$0xff]  ;;  %v1660_v32 = vld [vmem:[%s4508_s25 + $0x69] sm:$0xff]  ;;  %v1661_v33 = vld [vmem:[%s4508_s25 + $0x71] sm:$0xff]  ;;  %5985 = vst [vmem:[#allocation5_spill] sm:$0xff] %v5984_v50  ;;  %v5987_v53 = vsel %vm4612_vm4, 4294967295, %v5986_v53  ;;  %v2400_v9 = vsel %vm5927_vm0, %v4530_v21, 0 }
  0x18   : > { %3893 = vmatpush3.bf16.msra.mxu1 %v770_v14  ;;  %3997 = vmatmul.mubr.msk.bf16.vlgmr.msra.gmra.mrb[0].mxu0 %vm5929_vm1, %v4517_v15  ;;  %v1662_v34 = vld [vmem:[%s4508_s25 + $0x79] sm:$0xff]  ;;  %v4570_v36 = vpack.c.bf16 %v1660_v32, %v1659_v31  ;;  %v1663_v42 = vld [vmem:[%s4508_s25 + $0x81] sm:$0xff]  ;;  %v1664_v43 = vld [vmem:[%s4508_s25 + $0x89] sm:$0xff]  ;;  %5988 = vst [vmem:[#allocation6_spill] sm:$0xff] %v5987_v53  ;;  %vm4650_vm5 = vcmp.ne.s32.totalorder %v223_v0, 15  ;;  %v5991_v10 = vmov 0 }
  0x19   : > { %4029 = vmatpush3.bf16.msra.mxu0 %v2074_v18  ;;  %3864 = vmatprep.mubr.msk.bf16.mxu1 %vm5929_vm1, %v4517_v15  ;;  %v4572_v37 = vpack.c.bf16 %v1662_v34, %v1661_v33  ;;  %v4582_v40 = vld [vmem:[%s4508_s25 + $0x1a] sm:$0xff]  ;;  %v4594_v44 = vld [vmem:[%s4508_s25 + $0x12] sm:$0xff]  ;;  %v4599_v48 = vpack.c.bf16 %v1664_v43, %v1663_v42  ;;  %v4607_v51 = vld [vmem:[%s4508_s25 + $0x2a] sm:$0xff]  ;;  %v5992_v10 = vsel %vm4650_vm5, 4294967295, %v5991_v10  ;;  %v197_v12 = vadd.s32 104, %v4549_v27 }
  0x1a   : > { %4000 = vmatprep.mubr.msk.bf16.mxu0 %vm5929_vm1, %v4523_v19  ;;  %4429 = vmatprep.subr.msk.bf16.mxu0 %vm5927_vm0, %v4530_v21  ;;  %v1976_v45 = vsel %vm4577_vm2, %v4582_v40, 0.0  ;;  %v4617_v54 = vld [vmem:[%s4508_s25 + $0x3a] sm:$0xff]  ;;  %v475_v56 = vld [vmem:[%s4508_s25 + $0x91] sm:$0xff]  ;;  %v4628_v58 = vld [vmem:[%s4508_s25 + $0x22] sm:$0xff]  ;;  %v1978_v59 = vsel %vm4602_vm3, %v4607_v51, 0.0  ;;  %5993 = vst [vmem:[#allocation9_spill] sm:$0xff] %v5992_v10 }
  0x1b   : > { %4424 = vmatprep.subr.msk.bf16.mxu1 %vm5927_vm0, %v4537_v22  ;;  %5979 = vst [vmem:[#allocation3_spill] sm:$0xff] %v4572_v37  ;;  %5982 = vst [vmem:[#allocation4_spill] sm:$0xff] %v4599_v48  ;;  %v2007_v49 = vpack.c.bf16 %v1976_v45, %v4594_v44  ;;  %v476_v57 = vld [vmem:[%s4508_s25 + $0x99] sm:$0xff]  ;;  %v477_v60 = vld [vmem:[%s4508_s25 + $0xa1] sm:$0xff]  ;;  %v1980_v63 = vsel %vm4612_vm4, %v4617_v54, 0.0  ;;  %v2008_v5 = vpack.c.bf16 %v1978_v59, %v4628_v58  ;;  %vm4660_vm6 = vcmp.ne.s32.totalorder %v225_v4, 15 }
  0x1c   : > { %v478_v61 = vld [vmem:[%s4508_s25 + $0xa9] sm:$0xff]  ;;  %v4636_v62 = vld [vmem:[%s4508_s25 + $0x32] sm:$0xff]  ;;  %v4641_v2 = vpack.c.bf16 %v476_v57, %v475_v56  ;;  %v5994_v13 = vmov 0  ;;  %v4665_v14 = vld [vmem:[%s4508_s25 + $0x5a] sm:$0xff]  ;;  %v199_v16 = vadd.s32 120, %v4549_v27  ;;  %v201_v21 = vadd.s32 136, %v4549_v27 }
  0x1d   : > { %v4644_v6 = vpack.c.bf16 %v478_v61, %v477_v60  ;;  %v2009_v7 = vpack.c.bf16 %v1980_v63, %v4636_v62  ;;  %v4655_v11 = vld [vmem:[%s4508_s25 + $0x4a] sm:$0xff]  ;;  %v5995_v13 = vsel %vm4660_vm6, 4294967295, %v5994_v13  ;;  %v480_v20 = vld [vmem:[%s4508_s25 + $0xb9] sm:$0xff]  ;;  %v4681_v23 = vld [vmem:[%s4508_s25 + $0x42] sm:$0xff]  ;;  %v227_v30 = vand.u32 15, %v195_v8 }
  0x1e   : > { %5989 = vst [vmem:[#allocation7_spill] sm:$0xff] %v4641_v2  ;;  %5996 = vst [vmem:[#allocation10_spill] sm:$0xff] %v5995_v13  ;;  %v4671_v17 = vld [vmem:[%s5921_s1 + $0xe] sm:$0x3]  ;;  %v479_v18 = vld [vmem:[%s4508_s25 + $0xb1] sm:$0xff]  ;;  %v1982_v24 = vsel %vm4650_vm5, %v4655_v11, 0.0 }
  0x1f   : > { %3865 = vmatmul.mubr.msk.bf16.gmra.mrb[4].mxu1 %vm5929_vm1, %v4523_v19  ;;  %5990 = vst [vmem:[#allocation8_spill] sm:$0xff] %v4644_v6  ;;  %v481_v25 = vld [vmem:[%s4508_s25 + $0xc1] sm:$0xff]  ;;  %v482_v26 = vld [vmem:[%s4508_s25 + $0xc9] sm:$0xff]  ;;  %v1951_v31 = vld [vmem:[%s4508_s25 + $0x52] sm:$0xff]  ;;  %v1984_v32 = vsel %vm4660_vm6, %v4665_v14, 0.0  ;;  %v229_v33 = vand.u32 15, %v197_v12  ;;  %v4694_v34 = vpack.c.bf16 %v480_v20, %v479_v18  ;;  %v2010_v41 = vpack.c.bf16 %v1982_v24, %v4681_v23 }
  0x20   : > { %4001 = vmatmul.mubr.msk.bf16.gmra.mrb[4].mxu0 %vm5929_vm1, %v4553_v28  ;;  %3868 = vmatprep.mubr.msk.bf16.mxu1 %vm5929_vm1, %v4553_v28  ;;  %v231_v35 = vand.u32 15, %v199_v16  ;;  %v4698_v42 = vpack.c.bf16 %v482_v26, %v481_v25  ;;  %v233_v43 = vand.u32 15, %v201_v21  ;;  %v4701_v45 = vadd.s32 16, %v4549_v27  ;;  %v1956_v55 = vld [vmem:[%s4508_s25 + $0x7a] sm:$0xff]  ;;  %v483_v57 = vld [vmem:[%s4508_s25 + $0xd1] sm:$0xff]  ;;  %v486_v4 = vld [vmem:[%s4508_s25 + $0xe9] sm:$0xff] }
  0x21   : > { %4004 = vmatprep.mubr.msk.bf16.mxu0 %vm5929_vm1, %v4555_v29  ;;  %5997 = vst [vmem:[#allocation11_spill] sm:$0xff] %v4694_v34  ;;  %v2011_v46 = vpack.c.bf16 %v1984_v32, %v1951_v31  ;;  %vm4703_vm7 = vcmp.ne.s32.totalorder %v227_v30, 15  ;;  %v5999_v47 = vmov 0  ;;  %vm4708_vm8 = vcmp.ne.s32.totalorder %v229_v33, 15  ;;  %v484_v59 = vld [vmem:[%s4508_s25 + $0xd9] sm:$0xff]  ;;  %v485_v0 = vld [vmem:[%s4508_s25 + $0xe1] sm:$0xff] }
  0x22   : > { %5998 = vst [vmem:[#allocation12_spill] sm:$0xff] %v4698_v42  ;;  %v6000_v47 = vsel %vm4703_vm7, 4294967295, %v5999_v47  ;;  %v6002_v52 = vmov 0  ;;  %v203_v56 = vadd.s32 152, %v4549_v27  ;;  %vm4718_vm9 = vcmp.ne.s32.totalorder %v231_v35, 15  ;;  %v1955_v12 = vld [vmem:[%s4508_s25 + $0x72] sm:$0xff] }
  0x23   : > { %6001 = vst [vmem:[#allocation13_spill] sm:$0xff] %v6000_v47  ;;  %v6003_v52 = vsel %vm4708_vm8, 4294967295, %v6002_v52  ;;  %v6005_v60 = vmov 0  ;;  %v205_v61 = vadd.s32 168, %v4549_v27  ;;  %vm4730_vm10 = vcmp.ne.s32.totalorder %v216_v38, 0  ;;  %v2891_v39 = vld [vmem:[%s4508_s25 + $0x32] sm:$0xff] }
  0x24   : > { %6004 = vst [vmem:[#allocation14_spill] sm:$0xff] %v6003_v52  ;;  %v6006_v60 = vsel %vm4718_vm9, 4294967295, %v6005_v60  ;;  %vm4734_vm11 = vcmp.ne.s32.totalorder %v233_v43, 15  ;;  %v1988_v16 = vsel %vm4708_vm8, %v1956_v55, 0.0  ;;  %v207_v18 = vadd.s32 184, %v4549_v27  ;;  %v1958_v43 = vld [vmem:[%s4508_s25 + $0x8a] sm:$0xff] }
  0x25   : > { %6007 = vst [vmem:[#allocation15_spill] sm:$0xff] %v6006_v60  ;;  %v209_v20 = vadd.s32 200, %v4549_v27  ;;  %v1032_v21 = vsel %vm4602_vm3, %v4582_v40, 0.0  ;;  %v4749_v24 = vpack.c.bf16 %v484_v59, %v483_v57  ;;  %v235_v25 = vand.u32 15, %v203_v56  ;;  %v312_v56 = vld [vmem:[%s4508_s25] sm:$0xff] }
  0x26   : > { %v4752_v26 = vadd.s32 32, %v4549_v27  ;;  %v4755_v30 = vpack.c.bf16 %v1032_v21, %v4594_v44  ;;  %v4757_v32 = vpack.c.bf16 %v486_v4, %v485_v0  ;;  %v237_v33 = vand.u32 15, %v205_v61  ;;  %v1960_v57 = vld [vmem:[%s4508_s25 + $0x9a] sm:$0xff] }
  0x27   : > { %3869 = vmatmul.mubr.msk.bf16.gmra.mrb[8].mxu1 %vm5929_vm1, %v4555_v29  ;;  %6013 = vst [vmem:[#allocation17_spill] sm:$0xff] %v4749_v24  ;;  %v1034_v35 = vsel %vm4612_vm4, %v4607_v51, 0.0  ;;  %v1036_v40 = vsel %vm4650_vm5, %v4617_v54, 0.0  ;;  %v239_v59 = vand.u32 15, %v207_v18  ;;  %v241_v61 = vand.u32 15, %v209_v20  ;;  %v488_v4 = vld [vmem:[%s4508_s25 + $0xf9] sm:$0xff] }
  0x28   : > { %4005 = vmatmul.mubr.msk.bf16.gmra.mrb[8].mxu0 %vm5929_vm1, %v4570_v36  ;;  %3872 = vmatprep.mubr.msk.bf16.mxu1 %vm5929_vm1, %v4570_v36  ;;  %6014 = vst [vmem:[#allocation18_spill] sm:$0xff] %v4757_v32  ;;  %v4770_v44 = vpack.c.bf16 %v1036_v40, %v4636_v62  ;;  %v1038_v51 = vsel %vm4660_vm6, %v4655_v11, 0.0  ;;  %v1040_v54 = vsel %vm4703_vm7, %v4665_v14, 0.0  ;;  %vm4780_vm12 = vcmp.ne.s32.totalorder %v235_v25, 15  ;;  %v487_v11 = vld [vmem:[%s4508_s25 + $0xf1] sm:$0xff]  ;;  %v1957_v18 = vld [vmem:[%s4508_s25 + $0x82] sm:$0xff] }
  0x29   : > { %4008 = vmatprep.mubr.msk.bf16.mxu0 %vm5929_vm1, %v4572_v37  ;;  %v220_v62 = vand.u32 15, %v4752_v26  ;;  %v4788_v0 = vpack.c.bf16 %v1040_v54, %v1951_v31  ;;  %v1990_v14 = vsel %vm4718_vm9, %v1958_v43, 0.0  ;;  %vm4796_vm13 = vcmp.ne.s32.totalorder %v237_v33, 15  ;;  %v313_v20 = vld [vmem:[%s4508_s25 + $0x8] sm:$0xff]  ;;  %v1959_v25 = vld [vmem:[%s4508_s25 + $0x92] sm:$0xff] }
  0x2a   : > { %v1044_v31 = vsel %vm4718_vm9, %v1956_v55, 0.0  ;;  %v408_v21 = vsel %vm4730_vm10, %v312_v56, 0.0  ;;  %v1962_v33 = vld [vmem:[%s4508_s25 + $0xaa] sm:$0xff]  ;;  %vm4821_vm14 = vcmp.ne.s32.totalorder %v239_v59, 15  ;;  %v6021_v40 = vmov 0 }
  0x2b   : > { %v4816_v55 = vpack.c.bf16 %v1044_v31, %v1955_v12  ;;  %v6022_v40 = vsel %vm4821_vm14, 4294967295, %v6021_v40  ;;  %vm4825_vm15 = vcmp.ne.s32.totalorder %v241_v61, 15  ;;  %v1046_v56 = vsel %vm4734_vm11, %v1958_v43, 0.0  ;;  %v4836_v54 = vld [vmem:[%s4508_s25 + $0xca] sm:$0xff]  ;;  %v4849_v31 = vld [vmem:[%s4508_s25 + $0xc2] sm:$0xff] }
  0x2c   : > { %6023 = vst [vmem:[#allocation21_spill] sm:$0xff] %v6022_v40  ;;  %v1050_v61 = vsel %vm4796_vm13, %v1962_v33, 0.0  ;;  %v4846_v43 = vpack.c.bf16 %v488_v4, %v487_v11  ;;  %v190_v60 = vadd.s32 48, %v4549_v27  ;;  %v6028_v4 = vand.u32 15, %v4701_v45  ;;  %v315_v45 = vld [vmem:[%s4508_s25 + $0x18] sm:$0xff] }
  0x2d   : > { %v192_v47 = vadd.s32 64, %v4549_v27  ;;  %vm6077_vm5 = vcmask 31744   ;;  %v210_v13 = vadd.s32 208, %v4549_v27 }
  0x2e   : > { %6027 = vst [vmem:[#allocation23_spill] sm:$0xff] %v4846_v43  ;;  %vm6078_vm4 = vmmov %vm6077_vm5 }
  0x2f   : > { %3873 = vmatmul.mubr.msk.bf16.gmra.mrb[12].mxu1 %vm5929_vm1, %v4572_v37  ;;  %vm6079_vm3 = vmmov %vm6078_vm4 }
  0x30   : > { %4009 = vmatmul.mubr.msk.bf16.gmra.mrb[12].mxu0 %vm5929_vm1, %v4599_v48  ;;  %3876 = vmatprep.mubr.msk.bf16.mxu1 %vm5929_vm1, %v4599_v48  ;;  %v5057_v48 = vld [vmem:[%s4508_s25 + $0x70] sm:$0xff] }
  0x31   : > { %4030 = vmatprep.mubr.msk.bf16.mxu0 %vm5929_vm1, %v2007_v49  ;;  %v1954_v49 = vld [vmem:[%s4508_s25 + $0x6a] sm:$0xff] }
  0x32   : > { %v1986_v63 = vsel %vm4703_vm7, %v1954_v49, 0.0 }
  0x37   : > { %3877 = vmatmul.mubr.msk.bf16.gmra.mrb[16].mxu1 %vm5929_vm1, %v4641_v2 }
  0x38   : > { %4031 = vmatmul.mubr.msk.bf16.vlgmr.msra.gmra.mrb[0].mxu0 %vm5929_vm1, %v2008_v5  ;;  %3880 = vmatprep.mubr.msk.bf16.mxu1 %vm5929_vm1, %v4644_v6  ;;  %v5121_v5 = vld [vmem:[%s4508_s25 + $0x90] sm:$0xff] }
  0x39   : > { %4063 = vmatpush3.bf16.msra.mxu0 %v2400_v9  ;;  %4034 = vmatprep.mubr.msk.bf16.mxu0 %vm5929_vm1, %v2009_v7  ;;  %v6010_v7 = vmov 0  ;;  %v1953_v9 = vld [vmem:[%s4508_s25 + $0x62] sm:$0xff] }
  0x3a   : > { %4430 = vmatprep.subr.msk.bf16.mxu0 %vm5927_vm0, %v4671_v17  ;;  %v6011_v7 = vsel %vm4734_vm11, 4294967295, %v6010_v7  ;;  %v2012_v38 = vpack.c.bf16 %v1986_v63, %v1953_v9  ;;  %v4786_v63 = vpack.c.bf16 %v1038_v51, %v4681_v23  ;;  %v1042_v23 = vsel %vm4708_vm8, %v1954_v49, 0.0  ;;  %v1963_v51 = vld [vmem:[%s4508_s25 + $0xb2] sm:$0xff] }
  0x3b   : > { %6012 = vst [vmem:[#allocation16_spill] sm:$0xff] %v6011_v7  ;;  %v1992_v49 = vsel %vm4734_vm11, %v1960_v57, 0.0  ;;  %v4814_v26 = vpack.c.bf16 %v1042_v23, %v1953_v9  ;;  %v1048_v9 = vsel %vm4780_vm12, %v1960_v57, 0.0  ;;  %v440_v7 = vpack.c.bf16 %v313_v20, %v408_v21 }
  0x3c   : > { %v4840_v59 = vpack.c.bf16 %v1048_v9, %v1959_v25  ;;  %v2014_v9 = vpack.c.bf16 %v1990_v14, %v1957_v18  ;;  %v2015_v11 = vpack.c.bf16 %v1992_v49, %v1959_v25  ;;  %vm4864_vm0 = vcmp.ne.s32.totalorder %v6028_v4, 0  ;;  %v4875_v14 = vld [vmem:[%s4508_s25 + $0x20] sm:$0xff]  ;;  %v4890_v25 = vld [vmem:[%s4508_s25 + $0x28] sm:$0xff] }
  0x3d   : > { %vm6033_vm11 = vcmask 31744   ;;  %v1994_v20 = vsel %vm4780_vm12, %v1962_v33, 0.0  ;;  %v224_v49 = vand.u32 15, %v192_v47 }
  0x3e   : > { %vm6034_vm9 = vmmov %vm6033_vm11 }
  0x3f   : > { %3881 = vmatmul.mubr.msk.bf16.gmra.mrb[20].mxu1 %vm5929_vm1, %v4694_v34  ;;  %vm6035_vm8 = vmmov %vm6034_vm9 }
  0x40   : > { %4035 = vmatmul.mubr.msk.bf16.gmra.mrb[4].mxu0 %vm5929_vm1, %v2010_v41  ;;  %3884 = vmatprep.mubr.msk.bf16.mxu1 %vm5929_vm1, %v4698_v42  ;;  %v2013_v41 = vpack.c.bf16 %v1988_v16, %v1955_v12  ;;  %v6018_v16 = vmov 0  ;;  %v1961_v12 = vld [vmem:[%s4508_s25 + $0xa2] sm:$0xff]  ;;  %vm6036_vm7 = vmmov %vm6035_vm8 }
  0x41   : > { %4038 = vmatprep.mubr.msk.bf16.mxu0 %vm5929_vm1, %v2011_v46  ;;  %v4767_v46 = vpack.c.bf16 %v1034_v35, %v4628_v58  ;;  %v6015_v58 = vmov 0  ;;  %v6019_v16 = vsel %vm4796_vm13, 4294967295, %v6018_v16  ;;  %v1964_v35 = vld [vmem:[%s4508_s25 + $0xba] sm:$0xff]  ;;  %v4851_v57 = vpack.c.bf16 %v1050_v61, %v1961_v12 }
  0x42   : > { %v6016_v58 = vsel %vm4780_vm12, 4294967295, %v6015_v58  ;;  %6020 = vst [vmem:[#allocation20_spill] sm:$0xff] %v6019_v16  ;;  %v1052_v23 = vsel %vm4821_vm14, %v1964_v35, 0.0  ;;  %v1996_v33 = vsel %vm4796_vm13, %v1964_v35, 0.0  ;;  %v194_v16 = vadd.s32 80, %v4549_v27 }
  0x43   : > { %6017 = vst [vmem:[#allocation19_spill] sm:$0xff] %v6016_v58  ;;  %v4853_v8 = vpack.c.bf16 %v1052_v23, %v1963_v51  ;;  %v314_v23 = vld [vmem:[%s4508_s25 + $0x10] sm:$0xff]  ;;  %v2017_v35 = vpack.c.bf16 %v1996_v33, %v1963_v51 }
  0x44   : > { %v1355_v21 = vsel %vm4730_vm10, %v314_v23, 0.0 }
  0x47   : > { %3885 = vmatmul.mubr.msk.bf16.gmra.mrb[24].mxu1 %vm5929_vm1, %v4749_v24 }
  0x48   : > { %4039 = vmatmul.mubr.msk.bf16.gmra.mrb[8].mxu0 %vm5929_vm1, %v2012_v38  ;;  %3888 = vmatprep.mubr.msk.bf16.mxu1 %vm5929_vm1, %v4757_v32  ;;  %v6024_v38 = vmov 0  ;;  %v4982_v32 = vld [vmem:[%s4508_s25 + $0x50] sm:$0xff] }
  0x49   : > { %4042 = vmatprep.mubr.msk.bf16.mxu0 %vm5929_vm1, %v2013_v41  ;;  %v6025_v38 = vsel %vm4825_vm15, 4294967295, %v6024_v38  ;;  %v4838_v41 = vpack.c.bf16 %v1046_v56, %v1957_v18  ;;  %v1054_v56 = vsel %vm4825_vm15, %v4836_v54, 0.0  ;;  %vm4870_vm1 = vcmp.ne.s32.totalorder %v220_v62, 0 }
  0x4a   : > { %6026 = vst [vmem:[#allocation22_spill] sm:$0xff] %v6025_v38  ;;  %v4860_v52 = vpack.c.bf16 %v1054_v56, %v4849_v31  ;;  %v410_v18 = vsel %vm4864_vm0, %v314_v23, 0.0  ;;  %v222_v62 = vand.u32 15, %v190_v60  ;;  %v4895_v56 = vpack.c.bf16 %v315_v45, %v1355_v21  ;;  %v4913_v21 = vld [vmem:[%s4508_s25 + $0x30] sm:$0xff] }
  0x4b   : > { %v1357_v60 = vsel %vm4864_vm0, %v4875_v14, 0.0  ;;  %v2016_v23 = vpack.c.bf16 %v1994_v20, %v1961_v12  ;;  %v211_v12 = vadd.s32 216, %v4549_v27  ;;  %v1998_v20 = vsel %vm4821_vm14, %v4836_v54, 0.0 }
  0x4c   : > { %6037 = vst [vmem:[#allocation24_spill] sm:$0xff] %v4895_v56  ;;  %v1359_v40 = vsel %vm4870_vm1, %v4913_v21, 0.0 }
  0x4d   : > { %v243_v10 = vand.u32 15, %v211_v12  ;;  %v2018_v12 = vpack.c.bf16 %v1998_v20, %v4849_v31  ;;  %v4996_v31 = vld [vmem:[%s4508_s25 + $0x60] sm:$0xff]  ;;  %v198_v20 = vadd.s32 112, %v4549_v27 }
  0x4f   : > { %3889 = vmatmul.mubr.msk.bf16.gmra.mrb[28].mxu1 %vm6033_vm11, %v4846_v43  ;;  %v230_v42 = vand.u32 15, %v198_v20 }
  0x50   : > { %4043 = vmatmul.mubr.msk.bf16.gmra.mrb[12].mxu0 %vm6034_vm9, %v2014_v9  ;;  %3894 = vmatprep.mubr.msk.bf16.mxu1 %vm6035_vm8, %v440_v7  ;;  %v412_v7 = vsel %vm4870_vm1, %v4875_v14, 0.0  ;;  %v4903_v9 = vpack.c.bf16 %v4890_v25, %v1357_v60  ;;  %vm4908_vm8 = vcmp.ne.s32.totalorder %v222_v62, 0  ;;  %vm4916_vm9 = vcmp.ne.s32.totalorder %v224_v49, 0  ;;  %v4943_v49 = vld [vmem:[%s4508_s25 + $0x38] sm:$0xff]  ;;  %v5230_v60 = vld [vmem:[%s4508_s25 + $0xd0] sm:$0xff] }
  0x51   : > { %4046 = vmatprep.mubr.msk.bf16.mxu0 %vm6036_vm7, %v2015_v11  ;;  %v441_v11 = vpack.c.bf16 %v315_v45, %v410_v18  ;;  %vm6039_vm7 = vcmask 1041408   ;;  %v442_v58 = vpack.c.bf16 %v4890_v25, %v412_v7  ;;  %v4921_v45 = vld [vmem:[%s4508_s25 + $0x40] sm:$0xff]  ;;  %v196_v18 = vadd.s32 96, %v4549_v27 }
  0x52   : > { %6038 = vst [vmem:[#allocation25_spill] sm:$0xff] %v4903_v9  ;;  %v1128_v4 = vsel %vm6039_vm7, %v4537_v22, 0  ;;  %v4924_v22 = vld [vmem:[%s4508_s25 + $0xda] sm:$0xff]  ;;  %v414_v51 = vsel %vm4908_vm8, %v4913_v21, 0.0  ;;  %v213_v62 = vadd.s32 232, %v4549_v27  ;;  %vm6044_vm7 = vmmov %vm6033_vm11  ;;  %v416_v33 = vsel %vm4916_vm9, %v4921_v45, 0.0 }
  0x53   : > { %v4939_v7 = vld [vmem:[%s5921_s1 + $0x6] sm:$0x3]  ;;  %v2000_v54 = vsel %vm4825_vm15, %v4924_v22, 0.0  ;;  %vm6046_vm14 = vmmov %vm6044_vm7  ;;  %v228_v53 = vand.u32 15, %v196_v18  ;;  %v4963_v38 = vpack.c.bf16 %v4943_v49, %v1359_v40  ;;  %vm6057_vm15 = vcmask 31744   ;;  %v5040_v9 = vld [vmem:[%s4508_s25 + $0xf2] sm:$0xff] }
  0x54   : > { %v245_v50 = vand.u32 15, %v213_v62  ;;  %vm6062_vm12 = vmmov %vm6057_vm15  ;;  %6067 = vst [vmem:[#allocation33_spill] sm:$0xff] %v5040_v9  ;;  %v2309_v47 = vsel %vm4916_vm9, %v4996_v31, 0.0  ;;  %v5278_v62 = vld [vmem:[%s4508_s25 + $0xf8] sm:$0xff] }
  0x55   : > { %6048 = vst [vmem:[#allocation27_spill] sm:$0xff] %v4963_v38  ;;  %vm6063_vm6 = vmmov %vm6062_vm12 }
  0x56   : > { %vm5002_vm13 = vcmp.ne.s32.totalorder %v245_v50, 15 }
  0x57   : > { %3895 = vmatmul.mubr.msk.bf16.vlgmr.msra.gmra.mrb[0].mxu1 %vm6033_vm11, %v441_v11  ;;  %v226_v11 = vand.u32 15, %v194_v16  ;;  %vm6045_vm11 = vmmov %vm6044_vm7  ;;  %v1361_v16 = vsel %vm4908_vm8, %v4921_v45, 0.0 }
  0x58   : > { %3927 = vmatpush3.bf16.msra.mxu1 %v1128_v4  ;;  %4047 = vmatmul.mubr.msk.bf16.gmra.mrb[16].mxu0 %vm6044_vm7, %v2016_v23  ;;  %v4957_v4 = vld [vmem:[%s4508_s25 + $0x48] sm:$0xff]  ;;  %v4960_v23 = vld [vmem:[%s4508_s25 + $0xd2] sm:$0xff]  ;;  %vm6049_vm7 = vcmask 1041408  }
  0x59   : > { %3898 = vmatprep.mubr.msk.bf16.mxu1 %vm6045_vm11, %v442_v58  ;;  %4050 = vmatprep.mubr.msk.bf16.mxu0 %vm6046_vm14, %v2017_v35  ;;  %6047 = vst [vmem:[#allocation26_spill] sm:$0xff] %v4960_v23  ;;  %v4971_v58 = vpack.c.bf16 %v4957_v4, %v1361_v16  ;;  %v443_v35 = vpack.c.bf16 %v4943_v49, %v414_v51  ;;  %vm4977_vm14 = vcmp.ne.s32.totalorder %v226_v11, 0  ;;  %vm4984_vm11 = vcmp.ne.s32.totalorder %v243_v10, 15  ;;  %v4989_v51 = vld [vmem:[%s4508_s25 + $0xea] sm:$0xff]  ;;  %v5012_v11 = vld [vmem:[%s4508_s25 + $0x58] sm:$0xff] }
  0x5a   : > { %4425 = vmatprep.subr.msk.bf16.mxu1 %vm6049_vm7, %v4939_v7  ;;  %v444_v18 = vpack.c.bf16 %v4957_v4, %v416_v33  ;;  %v2019_v40 = vpack.c.bf16 %v2000_v54, %v4960_v23  ;;  %vm4991_vm7 = vcmp.ne.s32.totalorder %v228_v53, 0  ;;  %v215_v33 = vadd.s32 248, %v4549_v27  ;;  %v5007_v53 = vld [vmem:[%s4508_s25 + $0xfa] sm:$0xff]  ;;  %v2919_v16 = vld [vmem:[%s4508_s25 + $0x112] sm:$0xff] }
  0x5b   : > { %6050 = vst [vmem:[#allocation28_spill] sm:$0xff] %v4971_v58  ;;  %v200_v54 = vadd.s32 128, %v4549_v27  ;;  %v6058_v10 = vmov 0  ;;  %6061 = vst [vmem:[#allocation30_spill] sm:$0xff] %v5007_v53  ;;  %v418_v24 = vsel %vm4977_vm14, %v4982_v32, 0.0  ;;  %v2002_v50 = vsel %vm4984_vm11, %v4989_v51, 0.0 }
  0x5c   : > { %v6059_v10 = vsel %vm5002_vm13, 4294967295, %v6058_v10  ;;  %v5031_v58 = vld [vmem:[%s4508_s25 + $0x68] sm:$0xff]  ;;  %v247_v38 = vand.u32 15, %v215_v33  ;;  %v1365_v3 = vsel %vm4977_vm14, %v4996_v31, 0.0  ;;  %v445_v20 = vpack.c.bf16 %v5012_v11, %v418_v24 }
  0x5d   : > { %6060 = vst [vmem:[#allocation29_spill] sm:$0xff] %v6059_v10  ;;  %v232_v6 = vand.u32 15, %v200_v54  ;;  %v5046_v56 = vpack.c.bf16 %v5031_v58, %v1365_v3  ;;  %v6071_v3 = vmov 0  ;;  %v5064_v54 = vld [vmem:[%s4508_s25 + $0x10a] sm:$0xff]  ;;  %v202_v24 = vadd.s32 144, %v4549_v27 }
  0x5e   : > { %6074 = vst [vmem:[#allocation36_spill] sm:$0xff] %v5064_v54  ;;  %v5175_v10 = vld [vmem:[%s4508_s25 + $0xb0] sm:$0xff] }
  0x5f   : > { %3899 = vmatmul.mubr.msk.bf16.gmra.mrb[4].mxu1 %vm6057_vm15, %v443_v35  ;;  %v420_v35 = vsel %vm4991_vm7, %v4996_v31, 0.0  ;;  %6068 = vst [vmem:[#allocation34_spill] sm:$0xff] %v5046_v56  ;;  %vm5059_vm15 = vcmp.ne.s32.totalorder %v247_v38, 15  ;;  %v5079_v38 = vld [vmem:[%s4508_s25 + $0x78] sm:$0xff]  ;;  %v1367_v56 = vsel %vm4991_vm7, %v5057_v48, 0.0  ;;  %v214_v31 = vadd.s32 240, %v4549_v27 }
  0x60   : > { %4051 = vmatmul.mubr.msk.bf16.gmra.mrb[20].mxu0 %vm6062_vm12, %v2018_v12  ;;  %3902 = vmatprep.mubr.msk.bf16.mxu1 %vm6063_vm6, %v444_v18  ;;  %v1363_v12 = vsel %vm4916_vm9, %v4982_v32, 0.0  ;;  %vm6064_vm12 = vmmov %vm6063_vm6  ;;  %v5028_v18 = vld [vmem:[%s4508_s25 + $0xe2] sm:$0xff]  ;;  %vm5052_vm6 = vcmp.ne.s32.totalorder %v230_v42, 0  ;;  %v6072_v3 = vsel %vm5059_vm15, 4294967295, %v6071_v3 }
  0x61   : > { %4054 = vmatprep.mubr.msk.bf16.mxu0 %vm6064_vm12, %v2019_v40  ;;  %6065 = vst [vmem:[#allocation31_spill] sm:$0xff] %v5028_v18  ;;  %v5034_v34 = vpack.c.bf16 %v5012_v11, %v1363_v12  ;;  %v2004_v40 = vsel %vm5002_vm13, %v5007_v53, 0.0  ;;  %v2020_v33 = vpack.c.bf16 %v2002_v50, %v5028_v18  ;;  %v446_v12 = vpack.c.bf16 %v5031_v58, %v420_v35  ;;  %v5072_v42 = vld [vmem:[%s4508_s25 + $0x80] sm:$0xff]  ;;  %vm6080_vm13 = vmmov %vm6079_vm3 }
  0x62   : > { %6073 = vst [vmem:[#allocation35_spill] sm:$0xff] %v6072_v3  ;;  %vm5067_vm12 = vcmp.ne.s32.totalorder %v232_v6, 0  ;;  %v204_v35 = vadd.s32 160, %v4549_v27  ;;  %v2006_v6 = vsel %vm5059_vm15, %v5064_v54, 0.0  ;;  %v5101_v3 = vpack.c.bf16 %v5079_v38, %v1367_v56  ;;  %vm6097_vm15 = vmmov %vm6077_vm5 }
  0x63   : > { %6066 = vst [vmem:[#allocation32_spill] sm:$0xff] %v5034_v34  ;;  %v2021_v34 = vpack.c.bf16 %v2004_v40, %v5040_v9  ;;  %v422_v40 = vsel %vm5052_vm6, %v5057_v48, 0.0  ;;  %v234_v9 = vand.u32 15, %v202_v24  ;;  %v1369_v54 = vsel %vm5052_vm6, %v5072_v42, 0.0 }
  0x64   : > { %6082 = vst [vmem:[#allocation38_spill] sm:$0xff] %v5101_v3  ;;  %v236_v53 = vand.u32 15, %v204_v35  ;;  %v447_v18 = vpack.c.bf16 %v5079_v38, %v422_v40  ;;  %v5129_v35 = vld [vmem:[%s4508_s25 + $0xa0] sm:$0xff]  ;;  %v208_v40 = vadd.s32 192, %v4549_v27 }
  0x67   : > { %3903 = vmatmul.mubr.msk.bf16.gmra.mrb[8].mxu1 %vm6077_vm5, %v445_v20  ;;  %v5092_v20 = vld [vmem:[%s4508_s25 + $0x102] sm:$0xff] }
  0x68   : > { %4055 = vmatmul.mubr.msk.bf16.gmra.mrb[24].mxu0 %vm6078_vm4, %v2020_v33  ;;  %3906 = vmatprep.mubr.msk.bf16.mxu1 %vm6079_vm3, %v446_v12  ;;  %6081 = vst [vmem:[#allocation37_spill] sm:$0xff] %v5092_v20  ;;  %v5095_v33 = vld [vmem:[%s4508_s25 + $0x88] sm:$0xff]  ;;  %v424_v12 = vsel %vm5067_vm12, %v5072_v42, 0.0  ;;  %v2022_v24 = vpack.c.bf16 %v2006_v6, %v5092_v20  ;;  %vm5116_vm3 = vcmp.ne.s32.totalorder %v234_v9, 0  ;;  %vm5124_vm4 = vcmp.ne.s32.totalorder %v236_v53, 0 }
  0x69   : > { %4058 = vmatprep.mubr.msk.bf16.mxu0 %vm6080_vm13, %v2021_v34  ;;  %v2301_v34 = vsel %vm4730_vm10, %v4875_v14, 0.0  ;;  %v5110_v37 = vpack.c.bf16 %v5095_v33, %v1369_v54  ;;  %v448_v56 = vpack.c.bf16 %v5095_v33, %v424_v12  ;;  %v206_v14 = vadd.s32 176, %v4549_v27  ;;  %vm6088_vm10 = vmmov %vm6077_vm5 }
  0x6a   : > { %v2333_v3 = vpack.c.bf16 %v4890_v25, %v2301_v34  ;;  %vm6089_vm13 = vmmov %vm6077_vm5  ;;  %v5136_v25 = vld [vmem:[%s4508_s25 + $0x98] sm:$0xff]  ;;  %v426_v9 = vsel %vm5116_vm3, %v5121_v5, 0.0  ;;  %v2303_v53 = vsel %vm4864_vm0, %v4913_v21, 0.0  ;;  %v1371_v6 = vsel %vm5067_vm12, %v5121_v5, 0.0 }
  0x6b   : > { %6083 = vst [vmem:[#allocation39_spill] sm:$0xff] %v5110_v37  ;;  %v428_v12 = vsel %vm5124_vm4, %v5129_v35, 0.0  ;;  %v238_v34 = vand.u32 15, %v206_v14  ;;  %v1373_v61 = vsel %vm5116_vm3, %v5129_v35, 0.0  ;;  %v2305_v21 = vsel %vm4870_vm1, %v4921_v45, 0.0  ;;  %v5337_v37 = vld [vmem:[%s4508_s25 + $0x108] sm:$0xff] }
  0x6c   : > { %v449_v20 = vpack.c.bf16 %v5136_v25, %v426_v9  ;;  %v2334_v14 = vpack.c.bf16 %v4943_v49, %v2303_v53  ;;  %vm6093_vm1 = vcmask 1041408   ;;  %v5185_v49 = vld [vmem:[%s4508_s25 + $0xc0] sm:$0xff]  ;;  %v5192_v9 = vld [vmem:[%s5921_s1 + $0x10] sm:$0x3]  ;;  %v2319_v2 = vsel %vm5116_vm3, %v5175_v10, 0.0 }
  0x6d   : > { %vm5170_vm0 = vcmp.ne.s32.totalorder %v238_v34, 0  ;;  %v2694_v45 = vsel %vm6093_vm1, %v4671_v17, 0  ;;  %v335_v17 = vld [vmem:[%s4508_s25 + $0xb8] sm:$0xff]  ;;  %vm6098_vm1 = vmmov %vm6077_vm5  ;;  %v337_v34 = vld [vmem:[%s4508_s25 + $0xc8] sm:$0xff]  ;;  %v2321_v50 = vsel %vm5124_vm4, %v5185_v49, 0.0 }
  0x6e   : > { %v430_v53 = vsel %vm5170_vm0, %v5175_v10, 0.0  ;;  %vm6120_vm3 = vmmov %vm6098_vm1  ;;  %v2323_v23 = vsel %vm5170_vm0, %v5230_v60, 0.0 }
  0x6f   : > { %3907 = vmatmul.mubr.msk.bf16.gmra.mrb[12].mxu1 %vm6077_vm5, %v447_v18  ;;  %v5149_v18 = vld [vmem:[%s4508_s25 + $0xa8] sm:$0xff] }
  0x70   : > { %4059 = vmatmul.mubr.msk.bf16.gmra.mrb[28].mxu0 %vm6088_vm10, %v2022_v24  ;;  %3910 = vmatprep.mubr.msk.bf16.mxu1 %vm6089_vm13, %v448_v56  ;;  %v5155_v24 = vpack.c.bf16 %v5136_v25, %v1371_v6  ;;  %v5164_v56 = vpack.c.bf16 %v5149_v18, %v1373_v61  ;;  %v450_v6 = vpack.c.bf16 %v5149_v18, %v428_v12  ;;  %vm6096_vm13 = vmmov %vm6077_vm5  ;;  %v2307_v12 = vsel %vm4908_vm8, %v4982_v32, 0.0 }
  0x71   : > { %4064 = vmatprep.mubr.msk.bf16.mxu0 %vm6077_vm5, %v2333_v3  ;;  %v240_v3 = vand.u32 15, %v208_v40  ;;  %v1377_v32 = vsel %vm5170_vm0, %v5185_v49, 0.0  ;;  %vm6100_vm8 = vcmask 1041408   ;;  %vm6124_vm0 = vmmov %vm6098_vm1 }
  0x72   : > { %6090 = vst [vmem:[#allocation40_spill] sm:$0xff] %v5155_v24  ;;  %v2335_v24 = vpack.c.bf16 %v4957_v4, %v2305_v21  ;;  %v212_v4 = vadd.s32 224, %v4549_v27  ;;  %v242_v21 = vand.u32 15, %v210_v13  ;;  %v2336_v13 = vpack.c.bf16 %v5012_v11, %v2307_v12 }
  0x73   : > { %vm5180_vm10 = vcmp.ne.s32.totalorder %v240_v3, 0  ;;  %v2311_v11 = vsel %vm4977_vm14, %v5057_v48, 0.0 }
  0x74   : > { %v432_v61 = vsel %vm5180_vm10, %v5185_v49, 0.0  ;;  %v2299_v49 = vld [vmem:[%s4508_s25 + $0x110] sm:$0xff] }
  0x77   : > { %3911 = vmatmul.mubr.msk.bf16.gmra.mrb[16].mxu1 %vm6096_vm13, %v449_v20  ;;  %v1375_v20 = vsel %vm5124_vm4, %v5175_v10, 0.0  ;;  %vm6105_vm13 = vmmov %vm6098_vm1 }
  0x78   : > { %4065 = vmatmul.mubr.msk.bf16.vlgmr.msra.gmra.mrb[0].mxu0 %vm6077_vm5, %v2334_v14  ;;  %3914 = vmatprep.mubr.msk.bf16.mxu1 %vm6097_vm15, %v450_v6  ;;  %v5211_v3 = vpack.c.bf16 %v335_v17, %v1375_v20  ;;  %v244_v14 = vand.u32 15, %v212_v4  ;;  %v451_v6 = vpack.c.bf16 %v335_v17, %v430_v53  ;;  %v2337_v20 = vpack.c.bf16 %v5031_v58, %v2309_v47  ;;  %vm6106_vm5 = vmmov %vm6098_vm1  ;;  %v5244_v58 = vld [vmem:[%s4508_s25 + $0xd8] sm:$0xff]  ;;  %v5254_v53 = vld [vmem:[%s4508_s25 + $0xe8] sm:$0xff] }
  0x79   : > { %4097 = vmatpush3.bf16.msra.mxu0 %v2694_v45  ;;  %4068 = vmatprep.mubr.msk.bf16.mxu0 %vm6098_vm1, %v2335_v24  ;;  %v5221_v24 = vpack.c.bf16 %v337_v34, %v1377_v32  ;;  %v452_v45 = vpack.c.bf16 %v337_v34, %v432_v61  ;;  %vm5225_vm15 = vcmp.ne.s32.totalorder %v242_v21, 0  ;;  %v5238_v32 = vld [vmem:[%s4508_s25 + $0xe0] sm:$0xff]  ;;  %v246_v61 = vand.u32 15, %v214_v31 }
  0x7a   : > { %6099 = vst [vmem:[#allocation41_spill] sm:$0xff] %v5211_v3  ;;  %4431 = vmatprep.subr.msk.bf16.mxu0 %vm6100_vm8, %v5192_v9  ;;  %vm5233_vm9 = vcmp.ne.s32.totalorder %v244_v14, 0  ;;  %v434_v27 = vsel %vm5225_vm15, %v5230_v60, 0.0  ;;  %vm6107_vm8 = vmmov %vm6098_vm1  ;;  %v2313_v21 = vsel %vm4991_vm7, %v5072_v42, 0.0  ;;  %v2338_v14 = vpack.c.bf16 %v5079_v38, %v2311_v11 }
  0x7b   : > { %v436_v12 = vsel %vm5233_vm9, %v5238_v32, 0.0  ;;  %v453_v47 = vpack.c.bf16 %v5244_v58, %v434_v27  ;;  %v2339_v48 = vpack.c.bf16 %v5095_v33, %v2313_v21  ;;  %vm5266_vm14 = vcmp.ne.s32.totalorder %v246_v61, 0  ;;  %vm6112_vm7 = vmmov %vm6098_vm1  ;;  %v933_v33 = vld [vmem:[%s4508_s25 + $0x2] sm:$0xff] }
  0x7c   : > { %v454_v43 = vpack.c.bf16 %v5254_v53, %v436_v12  ;;  %v2315_v38 = vsel %vm5052_vm6, %v5121_v5, 0.0  ;;  %v2317_v31 = vsel %vm5067_vm12, %v5129_v35, 0.0  ;;  %vm6115_vm6 = vmmov %vm6098_vm1  ;;  %v2342_v5 = vpack.c.bf16 %v335_v17, %v2319_v2 }
  0x7d   : > { %v2340_v11 = vpack.c.bf16 %v5136_v25, %v2315_v38  ;;  %v2341_v61 = vpack.c.bf16 %v5149_v18, %v2317_v31  ;;  %vm6117_vm12 = vcmask 1041408   ;;  %v2343_v25 = vpack.c.bf16 %v337_v34, %v2321_v50  ;;  %v6167_v38 = vld [vmem:[#allocation27_spill] sm:$0xff]  ;;  %v6173_v31 = vld [vmem:[#allocation17_spill] sm:$0xff]  ;;  %v6179_v50 = vld [vmem:[#allocation34_spill] sm:$0xff] }
  0x7e   : > { %v1454_v35 = vsel %vm6117_vm12, %v4939_v7, 0  ;;  %v2325_v7 = vsel %vm5180_vm10, %v5238_v32, 0.0  ;;  %vm6121_vm4 = vmmov %vm6117_vm12  ;;  %v2331_v17 = vsel %vm5266_vm14, %v2299_v49, 0.0  ;;  %v2894_v49 = vld [vmem:[%s4508_s25 + $0x4a] sm:$0xff]  ;;  %v1381_v40 = vsel %vm5225_vm15, %v5238_v32, 0.0 }
  0x7f   : > { %3915 = vmatmul.mubr.msk.bf16.gmra.mrb[20].mxu1 %vm6105_vm13, %v451_v6  ;;  %vm6110_vm13 = vmmov %vm6098_vm1  ;;  %v2345_v10 = vpack.c.bf16 %v5254_v53, %v2325_v7  ;;  %v2626_v7 = vld [vmem:[%s4508_s25 + $0x119] sm:$0xff]  ;;  %v1400_v3 = vpack.c.bf16 %v5254_v53, %v1381_v40 }
  0x80   : > { %4069 = vmatmul.mubr.msk.bf16.gmra.mrb[4].mxu0 %vm6106_vm5, %v2336_v13  ;;  %3918 = vmatprep.mubr.msk.bf16.mxu1 %vm6098_vm1, %v452_v45  ;;  %v5271_v13 = vld [vmem:[%s4508_s25 + $0xf0] sm:$0xff]  ;;  %vm6111_vm5 = vmmov %vm6098_vm1 }
  0x81   : > { %4072 = vmatprep.mubr.msk.bf16.mxu0 %vm6107_vm8, %v2337_v20  ;;  %v934_v45 = vld [vmem:[%s4508_s25 + $0xa] sm:$0xff]  ;;  %v438_v42 = vsel %vm5266_vm14, %v5271_v13, 0.0  ;;  %vm6113_vm8 = vmmov %vm6098_vm1  ;;  %v2903_v53 = vld [vmem:[%s4508_s25 + $0x92] sm:$0xff] }
  0x82   : > { %v1030_v20 = vsel %vm4577_vm2, %v934_v45, 0.0  ;;  %v455_v27 = vpack.c.bf16 %v5278_v62, %v438_v42  ;;  %vm6126_vm12 = vmmov %vm6124_vm0  ;;  %v6164_v45 = vld [vmem:[#allocation2_spill] sm:$0xff]  ;;  %v6165_v42 = vld [vmem:[#allocation11_spill] sm:$0xff] }
  0x83   : > { %v1061_v12 = vpack.c.bf16 %v1030_v20, %v933_v33  ;;  %v6169_v33 = vld [vmem:[#allocation12_spill] sm:$0xff] }
  0x84   : > { %v6171_v20 = vld [vmem:[#allocation28_spill] sm:$0xff] }
  0x87   : > { %3919 = vmatmul.mubr.msk.bf16.gmra.mrb[24].mxu1 %vm6110_vm13, %v453_v47  ;;  %vm6114_vm13 = vmmov %vm6098_vm1  ;;  %v6157_v47 = vld [vmem:[#allocation7_spill] sm:$0xff] }
  0x88   : > { %4073 = vmatmul.mubr.msk.bf16.gmra.mrb[8].mxu0 %vm6111_vm5, %v2338_v14  ;;  %3922 = vmatprep.mubr.msk.bf16.mxu1 %vm6112_vm7, %v454_v43  ;;  %vm6116_vm5 = vmmov %vm6098_vm1  ;;  %v6159_v14 = vld [vmem:[#allocation24_spill] sm:$0xff] }
  0x89   : > { %4076 = vmatprep.mubr.msk.bf16.mxu0 %vm6098_vm1, %v2339_v48  ;;  %vm6118_vm7 = vmmov %vm6098_vm1  ;;  %v6161_v43 = vld [vmem:[#allocation8_spill] sm:$0xff]  ;;  %v6163_v48 = vld [vmem:[#allocation25_spill] sm:$0xff] }
  0x8f   : > { %3923 = vmatmul.mubr.msk.bf16.gmra.mrb[28].mxu1 %vm6113_vm8, %v455_v27  ;;  %vm6119_vm8 = vmmov %vm6098_vm1  ;;  %v6175_v27 = vld [vmem:[#allocation32_spill] sm:$0xff] }
  0x90   : > { %4077 = vmatmul.mubr.msk.bf16.gmra.mrb[12].mxu0 %vm6114_vm13, %v2340_v11  ;;  %3928 = vmatprep.mubr.msk.bf16.mxu1 %vm6115_vm6, %v1061_v12  ;;  %vm6122_vm13 = vmmov %vm6098_vm1  ;;  %v6177_v11 = vld [vmem:[#allocation18_spill] sm:$0xff] }
  0x91   : > { %4080 = vmatprep.mubr.msk.bf16.mxu0 %vm6116_vm5, %v2341_v61  ;;  %vm6123_vm6 = vmmov %vm6098_vm1  ;;  %v2623_v12 = vld [vmem:[%s4508_s25 + $0x101] sm:$0xff]  ;;  %v2624_v61 = vld [vmem:[%s4508_s25 + $0x109] sm:$0xff] }
  0x92   : > { %vm6125_vm5 = vmmov %vm6124_vm0  ;;  %v5423_v2 = vpack.c.bf16 %v2624_v61, %v2623_v12  ;;  %v6209_v12 = vld [vmem:[#allocation14_spill] sm:$0xff] }
  0x97   : > { %3929 = vmatmul.mubr.msk.bf16.vlgmr.msra.gmra.mrb[0].mxu1 %vm6118_vm7, %v4755_v30  ;;  %v2344_v30 = vpack.c.bf16 %v5244_v58, %v2323_v23  ;;  %vm6127_vm7 = vmmov %vm6124_vm0  ;;  %v2625_v23 = vld [vmem:[%s4508_s25 + $0x111] sm:$0xff] }
  0x98   : > { %3961 = vmatpush3.bf16.msra.mxu1 %v1454_v35  ;;  %4081 = vmatmul.mubr.msk.bf16.gmra.mrb[16].mxu0 %vm6098_vm1, %v2342_v5  ;;  %vm6128_vm1 = vmmov %vm6124_vm0  ;;  %v2890_v5 = vld [vmem:[%s4508_s25 + $0x2a] sm:$0xff] }
  0x99   : > { %3932 = vmatprep.mubr.msk.bf16.mxu1 %vm6119_vm8, %v4767_v46  ;;  %4084 = vmatprep.mubr.msk.bf16.mxu0 %vm6120_vm3, %v2343_v25  ;;  %v5327_v46 = vld [vmem:[%s4508_s25 + $0x100] sm:$0xff]  ;;  %vm6129_vm8 = vmmov %vm6124_vm0  ;;  %v6180_v35 = vld [vmem:[#allocation23_spill] sm:$0xff] }
  0x9a   : > { %4427 = vmatprep.subr.msk.bf16.mxu1 %vm6121_vm4, %v4483_v1  ;;  %v2327_v1 = vsel %vm5225_vm15, %v5271_v13, 0.0  ;;  %v2329_v54 = vsel %vm5233_vm9, %v5327_v46, 0.0  ;;  %vm6130_vm3 = vmmov %vm6124_vm0  ;;  %v6182_v25 = vld [vmem:[#allocation38_spill] sm:$0xff]  ;;  %v1385_v4 = vsel %vm5266_vm14, %v5327_v46, 0.0 }
  0x9b   : > { %v2347_v18 = vpack.c.bf16 %v5337_v37, %v2329_v54  ;;  %vm6131_vm4 = vmmov %vm6124_vm0  ;;  %v1402_v6 = vpack.c.bf16 %v5337_v37, %v1385_v4  ;;  %v6222_v37 = vld [vmem:[#allocation19_spill] sm:$0xff] }
  0x9f   : > { %3933 = vmatmul.mubr.msk.bf16.gmra.mrb[4].mxu1 %vm6122_vm13, %v4770_v44  ;;  %v2346_v44 = vpack.c.bf16 %v5278_v62, %v2327_v1  ;;  %vm6132_vm13 = vmmov %vm6124_vm0  ;;  %v2642_v1 = vpack.c.bf16 %v2626_v7, %v2625_v23  ;;  %v1665_v23 = vld [vmem:[%s4508_s25 + $0x91] sm:$0xff]  ;;  %v1666_v7 = vld [vmem:[%s4508_s25 + $0x99] sm:$0xff] }
  0xa0   : > { %4085 = vmatmul.mubr.msk.bf16.gmra.mrb[20].mxu0 %vm6123_vm6, %v2344_v30  ;;  %3936 = vmatprep.mubr.msk.bf16.mxu1 %vm6124_vm0, %v4786_v63  ;;  %v2300_v63 = vld [vmem:[%s4508_s25 + $0x118] sm:$0xff]  ;;  %vm6133_vm6 = vmmov %vm6124_vm0  ;;  %vm6134_vm0 = vcmask 1041408   ;;  %v2889_v30 = vld [vmem:[%s4508_s25 + $0x22] sm:$0xff] }
  0xa1   : > { %4088 = vmatprep.mubr.msk.bf16.mxu0 %vm6125_vm5, %v2345_v10  ;;  %v2348_v34 = vpack.c.bf16 %v2300_v63, %v2331_v17  ;;  %vm6135_vm5 = vmmov %vm6128_vm1  ;;  %v2922_v10 = vsel %vm4577_vm2, %v2890_v5, 0.0  ;;  %v6188_v63 = vld [vmem:[#allocation40_spill] sm:$0xff]  ;;  %v6191_v17 = vld [vmem:[#allocation5_spill] sm:$0xff] }
  0xa2   : > { %v2953_v54 = vpack.c.bf16 %v2922_v10, %v2889_v30  ;;  %vm6192_vm2 = vnez %v6191_v17  ;;  %v2905_v30 = vld [vmem:[%s4508_s25 + $0xa2] sm:$0xff]  ;;  %v6217_v10 = vld [vmem:[#allocation16_spill] sm:$0xff] }
  0xa3   : > { %v2907_v17 = vld [vmem:[%s4508_s25 + $0xb2] sm:$0xff] }
  0xa7   : > { %3937 = vmatmul.mubr.msk.bf16.gmra.mrb[8].mxu1 %vm6126_vm12, %v4788_v0  ;;  %v3020_v0 = vsel %vm6134_vm0, %v5192_v9, 0  ;;  %vm6136_vm12 = vmmov %vm6128_vm1  ;;  %v6155_v9 = vld [vmem:[#allocation33_spill] sm:$0xff] }
  0xa8   : > { %4089 = vmatmul.mubr.msk.bf16.gmra.mrb[24].mxu0 %vm6127_vm7, %v2346_v44  ;;  %3940 = vmatprep.mubr.msk.bf16.mxu1 %vm6128_vm1, %v4814_v26  ;;  %vm6137_vm7 = vmmov %vm6128_vm1  ;;  %v6144_v26 = vld [vmem:[#allocation26_spill] sm:$0xff] }
  0xa9   : > { %4092 = vmatprep.mubr.msk.bf16.mxu0 %vm6129_vm8, %v2347_v18  ;;  %vm6138_vm8 = vmmov %vm6128_vm1  ;;  %v2892_v44 = vld [vmem:[%s4508_s25 + $0x3a] sm:$0xff]  ;;  %v6185_v18 = vld [vmem:[#allocation39_spill] sm:$0xff] }
  0xaa   : > { %vm6146_vm0 = vmmov %vm6128_vm1 }
  0xaf   : > { %3941 = vmatmul.mubr.msk.bf16.gmra.mrb[12].mxu1 %vm6130_vm3, %v4816_v55  ;;  %vm6139_vm3 = vmmov %vm6128_vm1 }
  0xb0   : > { %4093 = vmatmul.mubr.msk.bf16.gmra.mrb[28].mxu0 %vm6131_vm4, %v2348_v34  ;;  %3944 = vmatprep.mubr.msk.bf16.mxu1 %vm6132_vm13, %v4838_v41  ;;  %vm6140_vm4 = vmmov %vm6128_vm1  ;;  %v2924_v34 = vsel %vm6192_vm2, %v2892_v44, 0.0 }
  0xb1   : > { %4098 = vmatprep.mubr.msk.bf16.mxu0 %vm6133_vm6, %v4517_v15  ;;  %v1056_v15 = vsel %vm4984_vm11, %v4924_v22, 0.0  ;;  %vm6141_vm13 = vmmov %vm6128_vm1 }
  0xb2   : > { %v1074_v55 = vpack.c.bf16 %v1056_v15, %v6144_v26  ;;  %v6193_v15 = vld [vmem:[#allocation6_spill] sm:$0xff] }
  0xb7   : > { %3945 = vmatmul.mubr.msk.bf16.gmra.mrb[16].mxu1 %vm6135_vm5, %v4840_v59  ;;  %vm6148_vm5 = vmmov %vm6146_vm0  ;;  %v6151_v59 = vld [vmem:[#allocation35_spill] sm:$0xff] }
  0xb8   : > { %4099 = vmatmul.mubr.msk.bf16.vlgmr.msra.gmra.mrb[0].mxu0 %vm6136_vm12, %v4523_v19  ;;  %3948 = vmatprep.mubr.msk.bf16.mxu1 %vm6137_vm7, %v4851_v57  ;;  %v6142_v19 = vld [vmem:[#allocation29_spill] sm:$0xff]  ;;  %vm6149_vm12 = vmmov %vm6146_vm0  ;;  %vm6152_vm7 = vnez %v6151_v59 }
  0xb9   : > { %4131 = vmatpush3.bf16.msra.mxu0 %v3020_v0  ;;  %4102 = vmatprep.mubr.msk.bf16.mxu0 %vm6128_vm1, %v4553_v28  ;;  %vm6143_vm6 = vnez %v6142_v19  ;;  %vm6154_vm1 = vmmov %vm6146_vm0  ;;  %v2893_v0 = vld [vmem:[%s4508_s25 + $0x42] sm:$0xff] }
  0xba   : > { %v1058_v28 = vsel %vm6143_vm6, %v4989_v51, 0.0 }
  0xbf   : > { %3949 = vmatmul.mubr.msk.bf16.gmra.mrb[20].mxu1 %vm6138_vm8, %v4853_v8  ;;  %v6145_v8 = vld [vmem:[#allocation31_spill] sm:$0xff]  ;;  %vm6156_vm8 = vmmov %vm6146_vm0 }
  0xc0   : > { %4103 = vmatmul.mubr.msk.bf16.gmra.mrb[4].mxu0 %vm6139_vm3, %v4555_v29  ;;  %3952 = vmatprep.mubr.msk.bf16.mxu1 %vm6140_vm4, %v4860_v52  ;;  %v1075_v41 = vpack.c.bf16 %v1058_v28, %v6145_v8  ;;  %v6147_v29 = vld [vmem:[#allocation3_spill] sm:$0xff]  ;;  %v6150_v52 = vld [vmem:[#allocation30_spill] sm:$0xff]  ;;  %vm6158_vm3 = vmmov %vm6146_vm0 }
  0xc1   : > { %4106 = vmatprep.mubr.msk.bf16.mxu0 %vm6141_vm13, %v4570_v36  ;;  %v1060_v57 = vsel %vm6152_vm7, %v6150_v52, 0.0  ;;  %v6153_v36 = vld [vmem:[#allocation4_spill] sm:$0xff]  ;;  %vm6160_vm4 = vmmov %vm6146_vm0 }
  0xc2   : > { %v1076_v21 = vpack.c.bf16 %v1060_v57, %v6155_v9  ;;  %vm6162_vm13 = vmmov %vm6146_vm0  ;;  %v2898_v57 = vld [vmem:[%s4508_s25 + $0x6a] sm:$0xff] }
  0xc7   : > { %3953 = vmatmul.mubr.msk.bf16.gmra.mrb[24].mxu1 %vm6146_vm0, %v1074_v55  ;;  %v2954_v55 = vpack.c.bf16 %v2924_v34, %v2891_v39  ;;  %v1668_v39 = vld [vmem:[%s4508_s25 + $0xa9] sm:$0xff] }
  0xc8   : > { %4107 = vmatmul.mubr.msk.bf16.gmra.mrb[8].mxu0 %vm6148_vm5, %v6147_v29  ;;  %3956 = vmatprep.mubr.msk.bf16.mxu1 %vm6149_vm12, %v1075_v41  ;;  %vm6166_vm5 = vmmov %vm6146_vm0  ;;  %v2896_v29 = vld [vmem:[%s4508_s25 + $0x5a] sm:$0xff] }
  0xc9   : > { %4110 = vmatprep.mubr.msk.bf16.mxu0 %vm6154_vm1, %v6153_v36  ;;  %vm6168_vm12 = vmmov %vm6146_vm0  ;;  %v6197_v36 = vld [vmem:[#allocation41_spill] sm:$0xff] }
  0xca   : > { %vm6170_vm1 = vmmov %vm6146_vm0 }
  0xcf   : > { %3957 = vmatmul.mubr.msk.bf16.gmra.mrb[28].mxu1 %vm6156_vm8, %v1076_v21  ;;  %vm6172_vm8 = vmmov %vm6146_vm0  ;;  %v2895_v21 = vld [vmem:[%s4508_s25 + $0x52] sm:$0xff] }
  0xd0   : > { %4111 = vmatmul.mubr.msk.bf16.gmra.mrb[12].mxu0 %vm6158_vm3, %v6157_v47  ;;  %3962 = vmatprep.mubr.msk.bf16.mxu1 %vm6160_vm4, %v6159_v14  ;;  %vm6174_vm3 = vmmov %vm6146_vm0  ;;  %v6199_v47 = vld [vmem:[#allocation9_spill] sm:$0xff] }
  0xd1   : > { %4114 = vmatprep.mubr.msk.bf16.mxu0 %vm6162_vm13, %v6161_v43  ;;  %vm6176_vm4 = vmmov %vm6146_vm0  ;;  %v1379_v43 = vsel %vm5180_vm10, %v5230_v60, 0.0  ;;  %v2899_v60 = vld [vmem:[%s4508_s25 + $0x72] sm:$0xff] }
  0xd2   : > { %vm6178_vm13 = vmmov %vm6146_vm0 }
  0xd7   : > { %3963 = vmatmul.mubr.msk.bf16.vlgmr.msra.gmra.mrb[0].mxu1 %vm6146_vm0, %v6163_v48  ;;  %v2897_v48 = vld [vmem:[%s4508_s25 + $0x62] sm:$0xff] }
  0xd8   : > { %4165 = vmatpush3.bf16.msra.mxu1 %v6164_v45  ;;  %4115 = vmatmul.mubr.msk.bf16.gmra.mrb[16].mxu0 %vm6166_vm5, %v6165_v42  ;;  %vm6181_vm5 = vmmov %vm6146_vm0 }
  0xd9   : > { %3966 = vmatprep.mubr.msk.bf16.mxu1 %vm6168_vm12, %v6167_v38  ;;  %4118 = vmatprep.mubr.msk.bf16.mxu0 %vm6170_vm1, %v6169_v33  ;;  %vm6183_vm12 = vmmov %vm6146_vm0  ;;  %v1399_v38 = vpack.c.bf16 %v5244_v58, %v1379_v43  ;;  %v6207_v58 = vld [vmem:[#allocation13_spill] sm:$0xff] }
  0xda   : > { %vm6184_vm1 = vmmov %vm6146_vm0  ;;  %v6230_v43 = vld [vmem:[#allocation21_spill] sm:$0xff] }
  0xdb   : > { %vm6204_vm2 = vmmov %vm6184_vm1 }
  0xdf   : > { %3967 = vmatmul.mubr.msk.bf16.gmra.mrb[4].mxu1 %vm6172_vm8, %v6171_v20  ;;  %vm6186_vm8 = vmmov %vm6146_vm0  ;;  %v2900_v20 = vld [vmem:[%s4508_s25 + $0x7a] sm:$0xff] }
  0xe0   : > { %4119 = vmatmul.mubr.msk.bf16.gmra.mrb[20].mxu0 %vm6174_vm3, %v6173_v31  ;;  %3970 = vmatprep.mubr.msk.bf16.mxu1 %vm6176_vm4, %v6175_v27  ;;  %vm6187_vm3 = vmmov %vm6146_vm0  ;;  %v2902_v31 = vld [vmem:[%s4508_s25 + $0x8a] sm:$0xff] }
  0xe1   : > { %4122 = vmatprep.mubr.msk.bf16.mxu0 %vm6178_vm13, %v6177_v11  ;;  %vm6189_vm4 = vmmov %vm6146_vm0  ;;  %v2901_v11 = vld [vmem:[%s4508_s25 + $0x82] sm:$0xff] }
  0xe2   : > { %vm6190_vm13 = vmmov %vm6146_vm0 }
  0xe7   : > { %3971 = vmatmul.mubr.msk.bf16.gmra.mrb[8].mxu1 %vm6146_vm0, %v6179_v50  ;;  %vm6194_vm0 = vnez %v6193_v15  ;;  %v1670_v15 = vld [vmem:[%s4508_s25 + $0xb9] sm:$0xff] }
  0xe8   : > { %4123 = vmatmul.mubr.msk.bf16.gmra.mrb[24].mxu0 %vm6181_vm5, %v6180_v35  ;;  %3974 = vmatprep.mubr.msk.bf16.mxu1 %vm6183_vm12, %v6182_v25  ;;  %v2926_v28 = vsel %vm6194_vm0, %v2894_v49, 0.0  ;;  %vm6195_vm5 = vmmov %vm6184_vm1  ;;  %v2904_v35 = vld [vmem:[%s4508_s25 + $0x9a] sm:$0xff]  ;;  %v2906_v25 = vld [vmem:[%s4508_s25 + $0xaa] sm:$0xff] }
  0xe9   : > { %4126 = vmatprep.mubr.msk.bf16.mxu0 %vm6184_vm1, %v5423_v2  ;;  %v2955_v41 = vpack.c.bf16 %v2926_v28, %v2893_v0  ;;  %vm6196_vm12 = vmmov %vm6184_vm1  ;;  %v2910_v49 = vld [vmem:[%s4508_s25 + $0xca] sm:$0xff]  ;;  %v2909_v28 = vld [vmem:[%s4508_s25 + $0xc2] sm:$0xff] }
  0xea   : > { %vm6205_vm0 = vmmov %vm6184_vm1  ;;  %v1669_v0 = vld [vmem:[%s4508_s25 + $0xb1] sm:$0xff] }
  0xeb   : > { %vm6206_vm10 = vmmov %vm6205_vm0 }
  0xec   : > { %vm6211_vm15 = vmmov %vm6205_vm0 }
  0xed   : > { %vm6219_vm14 = vmmov %vm6205_vm0 }
  0xef   : > { %3975 = vmatmul.mubr.msk.bf16.gmra.mrb[12].mxu1 %vm6186_vm8, %v6185_v18  ;;  %vm6198_vm8 = vmmov %vm6184_vm1  ;;  %v2908_v18 = vld [vmem:[%s4508_s25 + $0xba] sm:$0xff] }
  0xf0   : > { %4127 = vmatmul.mubr.msk.bf16.gmra.mrb[28].mxu0 %vm6187_vm3, %v2642_v1  ;;  %3978 = vmatprep.mubr.msk.bf16.mxu1 %vm6189_vm4, %v6188_v63  ;;  %vm6200_vm3 = vnez %v6199_v47  ;;  %v1667_v63 = vld [vmem:[%s4508_s25 + $0xa1] sm:$0xff] }
  0xf1   : > { %4132 = vmatprep.mubr.msk.bf16.mxu0 %vm6190_vm13, %v2953_v54  ;;  %v2928_v14 = vsel %vm6200_vm3, %v2896_v29, 0.0  ;;  %vm6203_vm13 = vmmov %vm6184_vm1  ;;  %v1689_v54 = vpack.c.bf16 %v1666_v7, %v1665_v23  ;;  %v1690_v29 = vpack.c.bf16 %v1668_v39, %v1667_v63  ;;  %v1671_v47 = vld [vmem:[%s4508_s25 + $0xc1] sm:$0xff] }
  0xf2   : > { %v2956_v42 = vpack.c.bf16 %v2928_v14, %v2895_v21  ;;  %v1672_v14 = vld [vmem:[%s4508_s25 + $0xc9] sm:$0xff] }
  0xf7   : > { %3979 = vmatmul.mubr.msk.bf16.gmra.mrb[16].mxu1 %vm6195_vm5, %v5164_v56  ;;  %v6201_v56 = vld [vmem:[#allocation10_spill] sm:$0xff]  ;;  %vm6208_vm5 = vnez %v6207_v58 }
  0xf8   : > { %4133 = vmatmul.mubr.msk.bf16.vlgmr.msra.gmra.mrb[0].mxu0 %vm6196_vm12, %v2954_v55  ;;  %3982 = vmatprep.mubr.msk.bf16.mxu1 %vm6184_vm1, %v6197_v36  ;;  %vm6202_vm4 = vnez %v6201_v56  ;;  %v2932_v27 = vsel %vm6208_vm5, %v2900_v20, 0.0  ;;  %vm6210_vm12 = vnez %v6209_v12  ;;  %vm6212_vm1 = vmmov %vm6205_vm0  ;;  %v6224_v55 = vld [vmem:[#allocation20_spill] sm:$0xff]  ;;  %v1691_v36 = vpack.c.bf16 %v1670_v15, %v1669_v0  ;;  %v1678_v58 = vld [vmem:[%s4508_s25 + $0xf9] sm:$0xff] }
  0xf9   : > { %4136 = vmatprep.mubr.msk.bf16.mxu0 %vm6198_vm8, %v2955_v41  ;;  %v2930_v45 = vsel %vm6202_vm4, %v2898_v57, 0.0  ;;  %v2934_v61 = vsel %vm6210_vm12, %v2902_v31, 0.0  ;;  %v2958_v32 = vpack.c.bf16 %v2932_v27, %v2899_v60  ;;  %vm6214_vm8 = vmmov %vm6205_vm0  ;;  %vm6218_vm4 = vnez %v6217_v10  ;;  %v1673_v56 = vld [vmem:[%s4508_s25 + $0xd1] sm:$0xff]  ;;  %v1676_v60 = vld [vmem:[%s4508_s25 + $0xe9] sm:$0xff] }
  0xfa   : > { %v2957_v33 = vpack.c.bf16 %v2930_v45, %v2897_v48  ;;  %v2959_v5 = vpack.c.bf16 %v2934_v61, %v2901_v11  ;;  %v2938_v1 = vsel %vm6218_vm4, %v2906_v25, 0.0  ;;  %vm6225_vm5 = vnez %v6224_v55  ;;  %vm6226_vm12 = vmmov %vm6205_vm0  ;;  %v1674_v45 = vld [vmem:[%s4508_s25 + $0xd9] sm:$0xff]  ;;  %v6238_v27 = vld [vmem:[#allocation36_spill] sm:$0xff] }
  0xfb   : > { %v2961_v44 = vpack.c.bf16 %v2938_v1, %v2905_v30  ;;  %v2942_v41 = vsel %vm6225_vm5, %v2910_v49, 0.0  ;;  %v1693_v31 = vpack.c.bf16 %v1674_v45, %v1673_v56  ;;  %vm6234_vm4 = vmmov %vm6205_vm0  ;;  %v6239_v61 = vld [vmem:[#allocation37_spill] sm:$0xff] }
  0xfc   : > { %v2963_v21 = vpack.c.bf16 %v2942_v41, %v2909_v28  ;;  %vm6241_vm5 = vmmov %vm6205_vm0 }
  0xff   : > { %3983 = vmatmul.mubr.msk.bf16.gmra.mrb[20].mxu1 %vm6203_vm13, %v5221_v24  ;;  %v1383_v24 = vsel %vm5233_vm9, %v5271_v13, 0.0  ;;  %vm6213_vm9 = vmmov %vm6205_vm0  ;;  %v6215_v13 = vld [vmem:[#allocation15_spill] sm:$0xff] }
 0x100   : > { %4137 = vmatmul.mubr.msk.bf16.gmra.mrb[4].mxu0 %vm6204_vm2, %v2956_v42  ;;  %3986 = vmatprep.mubr.msk.bf16.mxu1 %vm6205_vm0, %v1399_v38  ;;  %v1401_v50 = vpack.c.bf16 %v5278_v62, %v1383_v24  ;;  %vm6216_vm3 = vnez %v6215_v13  ;;  %vm6220_vm13 = vmmov %vm6205_vm0  ;;  %v6232_v42 = vld [vmem:[#allocation22_spill] sm:$0xff] }
 0x101   : > { %4140 = vmatprep.mubr.msk.bf16.mxu0 %vm6206_vm10, %v2957_v33  ;;  %v2936_v62 = vsel %vm6216_vm3, %v2904_v35, 0.0  ;;  %vm6221_vm2 = vmmov %vm6205_vm0  ;;  %vm6223_vm10 = vnez %v6222_v37  ;;  %vm6233_vm3 = vnez %v6232_v42  ;;  %v1692_v33 = vpack.c.bf16 %v1672_v14, %v1671_v47 }
 0x102   : > { %v2960_v46 = vpack.c.bf16 %v2936_v62, %v2903_v53  ;;  %v2940_v34 = vsel %vm6223_vm10, %v2908_v18, 0.0  ;;  %v2946_v38 = vsel %vm6233_vm3, %v4989_v51, 0.0  ;;  %v2948_v51 = vsel %vm4984_vm11, %v6150_v52, 0.0  ;;  %vm6240_vm10 = vmmov %vm6205_vm0 }
 0x103   : > { %v2962_v57 = vpack.c.bf16 %v2940_v34, %v2907_v17  ;;  %v2965_v40 = vpack.c.bf16 %v2946_v38, %v6145_v8  ;;  %v2950_v8 = vsel %vm6143_vm6, %v6238_v27, 0.0  ;;  %v2966_v11 = vpack.c.bf16 %v2948_v51, %v6155_v9  ;;  %vm6242_vm11 = vmmov %vm6205_vm0 }
 0x104   : > { %vm6243_vm6 = vmmov %vm6205_vm0 }
 0x107   : > { %3987 = vmatmul.mubr.msk.bf16.gmra.mrb[24].mxu1 %vm6211_vm15, %v1400_v3  ;;  %vm6227_vm15 = vmmov %vm6205_vm0  ;;  %v2967_v3 = vpack.c.bf16 %v2950_v8, %v6239_v61 }
 0x108   : > { %4141 = vmatmul.mubr.msk.bf16.gmra.mrb[8].mxu0 %vm6212_vm1, %v2958_v32  ;;  %3990 = vmatprep.mubr.msk.bf16.mxu1 %vm6213_vm9, %v1401_v50  ;;  %vm6228_vm1 = vmmov %vm6205_vm0  ;;  %v2920_v32 = vld [vmem:[%s4508_s25 + $0x11a] sm:$0xff] }
 0x109   : > { %4144 = vmatprep.mubr.msk.bf16.mxu0 %vm6214_vm8, %v2959_v5  ;;  %vm6229_vm9 = vmmov %vm6205_vm0  ;;  %vm6231_vm8 = vnez %v6230_v43  ;;  %v2952_v19 = vsel %vm6152_vm7, %v2920_v32, 0.0  ;;  %vm3215_vm7 = vcmask 64512  }
 0x10a   : > { %v2944_v48 = vsel %vm6231_vm8, %v4924_v22, 0.0  ;;  %v1675_v22 = vld [vmem:[%s4508_s25 + $0xe1] sm:$0xff]  ;;  %v2968_v52 = vpack.c.bf16 %v2952_v19, %v2919_v16 }
 0x10b   : > { %v2964_v20 = vpack.c.bf16 %v2944_v48, %v6144_v26  ;;  %v1677_v26 = vld [vmem:[%s4508_s25 + $0xf1] sm:$0xff]  ;;  %v1694_v24 = vpack.c.bf16 %v1676_v60, %v1675_v22 }
 0x10c   : > { %v1695_v12 = vpack.c.bf16 %v1678_v58, %v1677_v26 }
 0x10f   : > { %3991 = vmatmul.mubr.msk.bf16.gmra.mrb[28].mxu1 %vm6219_vm14, %v1402_v6  ;;  %vm6235_vm14 = vmmov %vm6205_vm0 }
 0x110   : > { %4145 = vmatmul.mubr.msk.bf16.gmra.mrb[12].mxu0 %vm6220_vm13, %v2960_v46  ;;  %4012 = vmatprep.mubr.msk.bf16.mxu1 %vm6221_vm2, %v1689_v54  ;;  %vm6236_vm13 = vmmov %vm6205_vm0 }
 0x111   : > { %4148 = vmatprep.mubr.msk.bf16.mxu0 %vm6205_vm0, %v2961_v44  ;;  %vm6237_vm2 = vmmov %vm6205_vm0 }
 0x117   : > { %4013 = vmatmul.mubr.msk.bf16.vlgmr.msra.gmra.mrb[16].mxu1 %vm6226_vm12, %v1690_v29  ;;  %vm6244_vm12 = vmmov %vm6205_vm0 }
 0x118   : > { %4149 = vmatmul.mubr.msk.bf16.gmra.mrb[16].mxu0 %vm6227_vm15, %v2962_v57  ;;  %4016 = vmatprep.mubr.msk.bf16.mxu1 %vm6228_vm1, %v1691_v36  ;;  %vm3451_vm15 = vcmask 1040384   ;;  %vm3453_vm1 = vcmask 58368  }
 0x119   : > { %4152 = vmatprep.mubr.msk.bf16.mxu0 %vm6229_vm9, %v2963_v21 }
 0x11f   : > { %4017 = vmatmul.mubr.msk.bf16.gmra.mrb[20].mxu1 %vm6234_vm4, %v1692_v33 }
 0x120   : > { %4153 = vmatmul.mubr.msk.bf16.gmra.mrb[20].mxu0 %vm6235_vm14, %v2964_v20  ;;  %4020 = vmatprep.mubr.msk.bf16.mxu1 %vm6236_vm13, %v1693_v31 }
 0x121   : > { %4156 = vmatprep.mubr.msk.bf16.mxu0 %vm6237_vm2, %v2965_v40 }
 0x127   : > { %4021 = vmatmul.mubr.msk.bf16.gmra.mrb[24].mxu1 %vm6205_vm0, %v1694_v24 }
 0x128   : > { %4157 = vmatmul.mubr.msk.bf16.gmra.mrb[24].mxu0 %vm6240_vm10, %v2966_v11  ;;  %4024 = vmatprep.mubr.msk.bf16.mxu1 %vm6241_vm5, %v1695_v12 }
 0x129   : > { %4160 = vmatprep.mubr.msk.bf16.mxu0 %vm6242_vm11, %v2967_v3 }
 0x12f   : > { %4025 = vmatmul.mubr.msk.bf16.gmra.mrb[28].mxu1 %vm6243_vm6, %v5423_v2 }
 0x130   : > { %4161 = vmatmul.mubr.msk.bf16.gmra.mrb[28].mxu0 %vm6244_vm12, %v2968_v52 }
 0x1aa   : > { %v3964_v9 = vpop.f32.mrb[0].mxu1 }
 0x1ab   : > { %v1490_v50 = vpop.f32.mrb[1].mxu1 }
 0x1ac   : > { %v3965_v5 = vpop.f32.mrb[2].mxu1 }
 0x1ad   : > { %v1493_v35 = vpop.f32.mrb[3].mxu1 }
 0x1b2   : > { %v3968_v25 = vpop.f32.mrb[4].mxu1 }
 0x1b3   : > { %v1506_v4 = vpop.f32.mrb[5].mxu1 }
 0x1b4   : > { %v3969_v53 = vpop.f32.mrb[6].mxu1 }
 0x1b5   : > { %v1509_v13 = vpop.f32.mrb[7].mxu1 }
 0x1ba   : > { %v3972_v62 = vpop.f32.mrb[8].mxu1 }
 0x1bb   : > { %v1522_v23 = vpop.f32.mrb[9].mxu1 }
 0x1bc   : > { %v3973_v7 = vpop.f32.mrb[10].mxu1 }
 0x1bd   : > { %v1525_v59 = vpop.f32.mrb[11].mxu1 }
 0x1c2   : > { %v5569_v30 = vpop.f32.mrb[12].mxu1 }
 0x1c3   : > { %v5571_v10 = vpop.f32.mrb[13].mxu1 }
 0x1c4   : > { %v5573_v2 = vpop.f32.mrb[14].mxu1 }
 0x1c5   : > { %v5575_v1 = vpop.f32.mrb[15].mxu1 }
 0x1cb   : > { %v4134_v6 = vpop.f32.mrb[0].mxu0 }
 0x1cc   : > { %v5583_v46 = vadd.f32 %v4134_v6, %v3964_v9  ;;  %v3056_v54 = vpop.f32.mrb[1].mxu0 }
 0x1cd   : > { %v5585_v44 = vadd.f32 %v3056_v54, %v1490_v50  ;;  %v4135_v18 = vpop.f32.mrb[2].mxu0 }
 0x1ce   : > { %3218 = vst.msk [vmem:[%s5581_s14 + $0x10] sm:$0xff] %vm3215_vm7, %v5583_v46  ;;  %v5590_v49 = vadd.f32 %v4135_v18, %v3965_v5  ;;  %v3059_v63 = vpop.f32.mrb[3].mxu0  ;;  %v3251_v0 = vsel %vm3215_vm7, %v5583_v46, 0.0 }
 0x1cf   : > { %3216 = vst.msk [vmem:[%s5581_s14] sm:$0xff] %vm3215_vm7, %v5585_v44  ;;  %v5595_v39 = vadd.f32 %v3059_v63, %v1493_v35  ;;  %v3248_v17 = vsel %vm3215_vm7, %v5585_v44, 0.0 }
 0x1d0   : > { %3219 = vst.msk [vmem:[%s5581_s14 + $0x18] sm:$0xff] %vm3215_vm7, %v5590_v49  ;;  %v3253_v29 = vsel %vm3215_vm7, %v5590_v49, 0.0 }
 0x1d1   : > { %3217 = vst.msk [vmem:[%s5581_s14 + $0x8] sm:$0xff] %vm3215_vm7, %v5595_v39  ;;  %v3249_v37 = vsel %vm3215_vm7, %v5595_v39, 0.0 }
 0x1d2   : > { %v3250_v34 = vadd.f32 %v3249_v37, %v3248_v17 }
 0x1d3   : > { %v4138_v15 = vpop.f32.mrb[4].mxu0 }
 0x1d4   : > { %v3252_v28 = vadd.f32 %v3251_v0, %v3250_v34  ;;  %v5609_v55 = vadd.f32 %v4138_v15, %v3968_v25  ;;  %v3072_v41 = vpop.f32.mrb[5].mxu0 }
 0x1d5   : > { %v5613_v57 = vadd.f32 %v3072_v41, %v1506_v4  ;;  %v4139_v36 = vpop.f32.mrb[6].mxu0 }
 0x1d6   : > { %3222 = vst.msk [vmem:[%s5581_s14 + $0x30] sm:$0xff] %vm3215_vm7, %v5609_v55  ;;  %v3254_v21 = vadd.f32 %v3253_v29, %v3252_v28  ;;  %v5618_v47 = vadd.f32 %v4139_v36, %v3969_v53  ;;  %v3075_v14 = vpop.f32.mrb[7].mxu0  ;;  %v3259_v38 = vsel %vm3215_vm7, %v5609_v55, 0.0 }
 0x1d7   : > { %3220 = vst.msk [vmem:[%s5581_s14 + $0x20] sm:$0xff] %vm3215_vm7, %v5613_v57  ;;  %v3255_v43 = vsel %vm3215_vm7, %v5613_v57, 0.0  ;;  %v5625_v48 = vadd.f32 %v3075_v14, %v1509_v13 }
 0x1d8   : > { %v3256_v56 = vadd.f32 %v3255_v43, %v3254_v21  ;;  %3223 = vst.msk [vmem:[%s5581_s14 + $0x38] sm:$0xff] %vm3215_vm7, %v5618_v47  ;;  %v3261_v22 = vsel %vm3215_vm7, %v5618_v47, 0.0 }
 0x1d9   : > { %3221 = vst.msk [vmem:[%s5581_s14 + $0x28] sm:$0xff] %vm3215_vm7, %v5625_v48  ;;  %v3257_v45 = vsel %vm3215_vm7, %v5625_v48, 0.0 }
 0x1da   : > { %v3258_v42 = vadd.f32 %v3257_v45, %v3256_v56 }
 0x1db   : > { %v4142_v33 = vpop.f32.mrb[8].mxu0 }
 0x1dc   : > { %v3260_v20 = vadd.f32 %v3259_v38, %v3258_v42  ;;  %v5637_v31 = vadd.f32 %v4142_v33, %v3972_v62  ;;  %v3088_v40 = vpop.f32.mrb[9].mxu0 }
 0x1dd   : > { %v5641_v60 = vadd.f32 %v3088_v40, %v1522_v23  ;;  %v4143_v51 = vpop.f32.mrb[10].mxu0 }
 0x1de   : > { %3226 = vst.msk [vmem:[%s5581_s14 + $0x50] sm:$0xff] %vm3215_vm7, %v5637_v31  ;;  %v3262_v26 = vadd.f32 %v3261_v22, %v3260_v20  ;;  %v5646_v58 = vadd.f32 %v4143_v51, %v3973_v7  ;;  %v3091_v27 = vpop.f32.mrb[11].mxu0  ;;  %v3267_v3 = vsel %vm3215_vm7, %v5637_v31, 0.0 }
 0x1df   : > { %3224 = vst.msk [vmem:[%s5581_s14 + $0x40] sm:$0xff] %vm3215_vm7, %v5641_v60  ;;  %v3263_v8 = vsel %vm3215_vm7, %v5641_v60, 0.0  ;;  %v5653_v24 = vadd.f32 %v3091_v27, %v1525_v59 }
 0x1e0   : > { %v3264_v11 = vadd.f32 %v3263_v8, %v3262_v26  ;;  %3227 = vst.msk [vmem:[%s5581_s14 + $0x58] sm:$0xff] %vm3215_vm7, %v5646_v58  ;;  %v3269_v9 = vsel %vm3215_vm7, %v5646_v58, 0.0 }
 0x1e1   : > { %3225 = vst.msk [vmem:[%s5581_s14 + $0x48] sm:$0xff] %vm3215_vm7, %v5653_v24  ;;  %v3265_v12 = vsel %vm3215_vm7, %v5653_v24, 0.0 }
 0x1e2   : > { %v3266_v61 = vadd.f32 %v3265_v12, %v3264_v11 }
 0x1e3   : > { %v4146_v32 = vpop.f32.mrb[12].mxu0 }
 0x1e4   : > { %v3268_v16 = vadd.f32 %v3267_v3, %v3266_v61  ;;  %v5666_v19 = vadd.f32 %v4146_v32, %v5569_v30  ;;  %v3104_v52 = vpop.f32.mrb[13].mxu0 }
 0x1e5   : > { %v5671_v50 = vadd.f32 %v3104_v52, %v5571_v10  ;;  %v4147_v5 = vpop.f32.mrb[14].mxu0 }
 0x1e6   : > { %3230 = vst.msk [vmem:[%s5581_s14 + $0x70] sm:$0xff] %vm3215_vm7, %v5666_v19  ;;  %v3270_v35 = vadd.f32 %v3269_v9, %v3268_v16  ;;  %v5677_v25 = vadd.f32 %v4147_v5, %v5573_v2  ;;  %v3107_v4 = vpop.f32.mrb[15].mxu0  ;;  %v3275_v30 = vsel %vm3215_vm7, %v5666_v19, 0.0 }
 0x1e7   : > { %3228 = vst.msk [vmem:[%s5581_s14 + $0x60] sm:$0xff] %vm3215_vm7, %v5671_v50  ;;  %v3271_v53 = vsel %vm3215_vm7, %v5671_v50, 0.0  ;;  %v5685_v13 = vadd.f32 %v3107_v4, %v5575_v1 }
 0x1e8   : > { %v3272_v62 = vadd.f32 %v3271_v53, %v3270_v35  ;;  %3231 = vst.msk [vmem:[%s5581_s14 + $0x78] sm:$0xff] %vm3215_vm7, %v5677_v25  ;;  %v3277_v63 = vsel %vm3215_vm7, %v5677_v25, 0.0 }
 0x1e9   : > { %3229 = vst.msk [vmem:[%s5581_s14 + $0x68] sm:$0xff] %vm3215_vm7, %v5685_v13  ;;  %v3273_v23 = vsel %vm3215_vm7, %v5685_v13, 0.0 }
 0x1ea   : > { %v3274_v7 = vadd.f32 %v3273_v23, %v3272_v62  ;;  %v4014_v59 = vpop.f32.mrb[16].mxu1 }
 0x1eb   : > { %v4150_v10 = vpop.f32.mrb[16].mxu0  ;;  %v1848_v2 = vpop.f32.mrb[17].mxu1 }
 0x1ec   : > { %v3276_v1 = vadd.f32 %v3275_v30, %v3274_v7  ;;  %v5697_v6 = vadd.f32 %v4150_v10, %v4014_v59  ;;  %v3120_v54 = vpop.f32.mrb[17].mxu0  ;;  %v4015_v18 = vpop.f32.mrb[18].mxu1 }
 0x1ed   : > { %v5701_v17 = vadd.f32 %v3120_v54, %v1848_v2  ;;  %v4151_v37 = vpop.f32.mrb[18].mxu0  ;;  %v1851_v34 = vpop.f32.mrb[19].mxu1 }
 0x1ee   : > { %3234 = vst.msk [vmem:[%s5581_s14 + $0x90] sm:$0xff] %vm3215_vm7, %v5697_v6  ;;  %v3278_v0 = vadd.f32 %v3277_v63, %v3276_v1  ;;  %v5706_v15 = vadd.f32 %v4151_v37, %v4015_v18  ;;  %v3123_v28 = vpop.f32.mrb[19].mxu0  ;;  %v3283_v56 = vsel %vm3215_vm7, %v5697_v6, 0.0 }
 0x1ef   : > { %3232 = vst.msk [vmem:[%s5581_s14 + $0x80] sm:$0xff] %vm3215_vm7, %v5701_v17  ;;  %v3279_v41 = vsel %vm3215_vm7, %v5701_v17, 0.0  ;;  %v5713_v29 = vadd.f32 %v3123_v28, %v1851_v34 }
 0x1f0   : > { %v3280_v36 = vadd.f32 %v3279_v41, %v3278_v0  ;;  %3235 = vst.msk [vmem:[%s5581_s14 + $0x98] sm:$0xff] %vm3215_vm7, %v5706_v15  ;;  %v3285_v22 = vsel %vm3215_vm7, %v5706_v15, 0.0 }
 0x1f1   : > { %3233 = vst.msk [vmem:[%s5581_s14 + $0x88] sm:$0xff] %vm3215_vm7, %v5713_v29  ;;  %v3281_v21 = vsel %vm3215_vm7, %v5713_v29, 0.0 }
 0x1f2   : > { %v3282_v14 = vadd.f32 %v3281_v21, %v3280_v36  ;;  %v4018_v43 = vpop.f32.mrb[20].mxu1 }
 0x1f3   : > { %v4154_v45 = vpop.f32.mrb[20].mxu0  ;;  %v1864_v42 = vpop.f32.mrb[21].mxu1 }
 0x1f4   : > { %v3284_v38 = vadd.f32 %v3283_v56, %v3282_v14  ;;  %v5725_v33 = vadd.f32 %v4154_v45, %v4018_v43  ;;  %v3136_v20 = vpop.f32.mrb[21].mxu0  ;;  %v4019_v40 = vpop.f32.mrb[22].mxu1 }
 0x1f5   : > { %v5729_v51 = vadd.f32 %v3136_v20, %v1864_v42  ;;  %v4155_v26 = vpop.f32.mrb[22].mxu0  ;;  %v1867_v27 = vpop.f32.mrb[23].mxu1 }
 0x1f6   : > { %3238 = vst.msk [vmem:[%s5581_s14 + $0xb0] sm:$0xff] %vm3215_vm7, %v5725_v33  ;;  %v3286_v8 = vadd.f32 %v3285_v22, %v3284_v38  ;;  %v5734_v11 = vadd.f32 %v4155_v26, %v4019_v40  ;;  %v3139_v12 = vpop.f32.mrb[23].mxu0  ;;  %v3291_v5 = vsel %vm3215_vm7, %v5725_v33, 0.0 }
 0x1f7   : > { %3236 = vst.msk [vmem:[%s5581_s14 + $0xa0] sm:$0xff] %vm3215_vm7, %v5729_v51  ;;  %v3287_v61 = vsel %vm3215_vm7, %v5729_v51, 0.0  ;;  %v5741_v3 = vadd.f32 %v3139_v12, %v1867_v27 }
 0x1f8   : > { %v3288_v32 = vadd.f32 %v3287_v61, %v3286_v8  ;;  %3239 = vst.msk [vmem:[%s5581_s14 + $0xb8] sm:$0xff] %vm3215_vm7, %v5734_v11  ;;  %v3293_v59 = vsel %vm3215_vm7, %v5734_v11, 0.0 }
 0x1f9   : > { %3237 = vst.msk [vmem:[%s5581_s14 + $0xa8] sm:$0xff] %vm3215_vm7, %v5741_v3  ;;  %v3289_v16 = vsel %vm3215_vm7, %v5741_v3, 0.0 }
 0x1fa   : > { %v3290_v52 = vadd.f32 %v3289_v16, %v3288_v32  ;;  %v4022_v9 = vpop.f32.mrb[24].mxu1 }
 0x1fb   : > { %v4158_v35 = vpop.f32.mrb[24].mxu0  ;;  %v1880_v4 = vpop.f32.mrb[25].mxu1 }
 0x1fc   : > { %v3292_v53 = vadd.f32 %v3291_v5, %v3290_v52  ;;  %v5753_v62 = vadd.f32 %v4158_v35, %v4022_v9  ;;  %v3152_v23 = vpop.f32.mrb[25].mxu0  ;;  %v4023_v7 = vpop.f32.mrb[26].mxu1 }
 0x1fd   : > { %v5757_v30 = vadd.f32 %v3152_v23, %v1880_v4  ;;  %v4159_v10 = vpop.f32.mrb[26].mxu0  ;;  %v1883_v2 = vpop.f32.mrb[27].mxu1 }
 0x1fe   : > { %3242 = vst.msk [vmem:[%s5581_s14 + $0xd0] sm:$0xff] %vm3215_vm7, %v5753_v62  ;;  %v3294_v1 = vadd.f32 %v3293_v59, %v3292_v53  ;;  %v5762_v54 = vadd.f32 %v4159_v10, %v4023_v7  ;;  %v3155_v18 = vpop.f32.mrb[27].mxu0  ;;  %v3299_v36 = vsel %vm3215_vm7, %v5753_v62, 0.0 }
 0x1ff   : > { %3240 = vst.msk [vmem:[%s5581_s14 + $0xc0] sm:$0xff] %vm3215_vm7, %v5757_v30  ;;  %v3295_v63 = vsel %vm3215_vm7, %v5757_v30, 0.0  ;;  %v5769_v37 = vadd.f32 %v3155_v18, %v1883_v2 }
 0x200   : > { %v3296_v34 = vadd.f32 %v3295_v63, %v3294_v1  ;;  %3243 = vst.msk [vmem:[%s5581_s14 + $0xd8] sm:$0xff] %vm3215_vm7, %v5762_v54  ;;  %v3301_v38 = vsel %vm3215_vm7, %v5762_v54, 0.0 }
 0x201   : > { %3241 = vst.msk [vmem:[%s5581_s14 + $0xc8] sm:$0xff] %vm3215_vm7, %v5769_v37  ;;  %v3297_v0 = vsel %vm3215_vm7, %v5769_v37, 0.0 }
 0x202   : > { %v3298_v28 = vadd.f32 %v3297_v0, %v3296_v34  ;;  %v4026_v41 = vpop.f32.mrb[28].mxu1 }
 0x203   : > { %v4162_v21 = vpop.f32.mrb[28].mxu0  ;;  %v1896_v14 = vpop.f32.mrb[29].mxu1 }
 0x204   : > { %v3300_v43 = vadd.f32 %v3299_v36, %v3298_v28  ;;  %v5781_v56 = vadd.f32 %v4162_v21, %v4026_v41  ;;  %v3168_v45 = vpop.f32.mrb[29].mxu0  ;;  %v4027_v42 = vpop.f32.mrb[30].mxu1 }
 0x205   : > { %v5785_v20 = vadd.f32 %v3168_v45, %v1896_v14  ;;  %v4163_v40 = vpop.f32.mrb[30].mxu0  ;;  %v1899_v22 = vpop.f32.mrb[31].mxu1 }
 0x206   : > { %3246 = vst.msk [vmem:[%s5581_s14 + $0xf0] sm:$0xff] %vm3215_vm7, %v5781_v56  ;;  %v3302_v26 = vadd.f32 %v3301_v38, %v3300_v43  ;;  %v5790_v27 = vadd.f32 %v4163_v40, %v4027_v42  ;;  %v3171_v8 = vpop.f32.mrb[31].mxu0  ;;  %v3307_v9 = vsel %vm3215_vm7, %v5781_v56, 0.0 }
 0x207   : > { %3244 = vst.msk [vmem:[%s5581_s14 + $0xe0] sm:$0xff] %vm3215_vm7, %v5785_v20  ;;  %v3303_v12 = vsel %vm3215_vm7, %v5785_v20, 0.0  ;;  %v5797_v61 = vadd.f32 %v3171_v8, %v1899_v22 }
 0x208   : > { %v3304_v32 = vadd.f32 %v3303_v12, %v3302_v26  ;;  %3247 = vst.msk [vmem:[%s5581_s14 + $0xf8] sm:$0xff] %vm3215_vm7, %v5790_v27  ;;  %v3309_v35 = vsel %vm3215_vm7, %v5790_v27, 0.0 }
 0x209   : > { %3245 = vst.msk [vmem:[%s5581_s14 + $0xe8] sm:$0xff] %vm3215_vm7, %v5797_v61  ;;  %v3305_v16 = vsel %vm3215_vm7, %v5797_v61, 0.0 }
 0x20a   : > { %v3306_v52 = vadd.f32 %v3305_v16, %v3304_v32 }
 0x20c   : > { %v3308_v5 = vadd.f32 %v3307_v9, %v3306_v52 }
 0x20e   : > { %v3310_v4 = vadd.f32 %v3309_v35, %v3308_v5 }
 0x210   : > { %v3311_v53 = vrot.slane %v3310_v4, 4 }
 0x212   : > { %v3312_v23 = vadd.f32 %v3311_v53, %v3310_v4 }
 0x214   : > { %v3313_v7 = vrot.slane %v3312_v23, 2 }
 0x216   : > { %v3314_v59 = vadd.f32 %v3313_v7, %v3312_v23 }
 0x218   : > { %v3315_v10 = vrot.slane %v3314_v59, 1 }
 0x21a   : > { %v5811_v2 = vadd.f32 %v3315_v10, %v3314_v59 }
 0x21c   : > { %v5814_v1 = vmul.f32 0.00390625, %v5811_v2 }
 0x21e   : > { %v3318_v18 = vsub.f32 %v5585_v44, %v5814_v1  ;;  %v3319_v63 = vsub.f32 %v5595_v39, %v5814_v1  ;;  %v3320_v34 = vsub.f32 %v5583_v46, %v5814_v1  ;;  %v3321_v0 = vsub.f32 %v5590_v49, %v5814_v1 }
 0x21f   : > { %v3322_v36 = vsub.f32 %v5613_v57, %v5814_v1  ;;  %v3323_v14 = vsub.f32 %v5625_v48, %v5814_v1  ;;  %v3324_v46 = vsub.f32 %v5609_v55, %v5814_v1  ;;  %v3325_v57 = vsub.f32 %v5618_v47, %v5814_v1 }
 0x220   : > { %v3350_v28 = vmul.f32 %v3318_v18, %v3318_v18  ;;  %v3351_v41 = vmul.f32 %v3319_v63, %v3319_v63  ;;  %v3352_v21 = vmul.f32 %v3320_v34, %v3320_v34  ;;  %v3353_v43 = vmul.f32 %v3321_v0, %v3321_v0 }
 0x221   : > { %v3354_v42 = vmul.f32 %v3322_v36, %v3322_v36  ;;  %v3355_v40 = vmul.f32 %v3323_v14, %v3323_v14  ;;  %v3326_v26 = vsub.f32 %v5641_v60, %v5814_v1  ;;  %v3356_v8 = vmul.f32 %v3324_v46, %v3324_v46 }
 0x222   : > { %v3382_v44 = vsel %vm3215_vm7, %v3350_v28, 0.0  ;;  %v3383_v39 = vsel %vm3215_vm7, %v3351_v41, 0.0  ;;  %v3385_v49 = vsel %vm3215_vm7, %v3352_v21, 0.0  ;;  %v3387_v22 = vsel %vm3215_vm7, %v3353_v43, 0.0 }
 0x223   : > { %v3384_v45 = vadd.f32 %v3383_v39, %v3382_v44  ;;  %v3389_v12 = vsel %vm3215_vm7, %v3354_v42, 0.0  ;;  %v3327_v55 = vsub.f32 %v5653_v24, %v5814_v1  ;;  %v3357_v16 = vmul.f32 %v3325_v57, %v3325_v57 }
 0x224   : > { %v3391_v52 = vsel %vm3215_vm7, %v3355_v40, 0.0  ;;  %v3328_v47 = vsub.f32 %v5637_v31, %v5814_v1  ;;  %v3358_v5 = vmul.f32 %v3326_v26, %v3326_v26  ;;  %v3393_v35 = vsel %vm3215_vm7, %v3356_v8, 0.0 }
 0x225   : > { %v3386_v38 = vadd.f32 %v3385_v49, %v3384_v45  ;;  %v3329_v60 = vsub.f32 %v5646_v58, %v5814_v1  ;;  %v3359_v53 = vmul.f32 %v3327_v55, %v3327_v55  ;;  %v3395_v23 = vsel %vm3215_vm7, %v3357_v16, 0.0 }
 0x226   : > { %v3330_v24 = vsub.f32 %v5671_v50, %v5814_v1  ;;  %v3360_v59 = vmul.f32 %v3328_v47, %v3328_v47  ;;  %v3397_v10 = vsel %vm3215_vm7, %v3358_v5, 0.0  ;;  %v3331_v31 = vsub.f32 %v5685_v13, %v5814_v1 }
 0x227   : > { %v3388_v48 = vadd.f32 %v3387_v22, %v3386_v38  ;;  %v3361_v63 = vmul.f32 %v3329_v60, %v3329_v60  ;;  %v3399_v34 = vsel %vm3215_vm7, %v3359_v53, 0.0  ;;  %v3332_v58 = vsub.f32 %v5666_v19, %v5814_v1 }
 0x228   : > { %v3362_v28 = vmul.f32 %v3330_v24, %v3330_v24  ;;  %v3401_v41 = vsel %vm3215_vm7, %v3360_v59, 0.0  ;;  %v3333_v50 = vsub.f32 %v5677_v25, %v5814_v1  ;;  %v3363_v21 = vmul.f32 %v3331_v31, %v3331_v31 }
 0x229   : > { %v3390_v32 = vadd.f32 %v3389_v12, %v3388_v48  ;;  %v3403_v14 = vsel %vm3215_vm7, %v3361_v63, 0.0  ;;  %v3334_v13 = vsub.f32 %v5701_v17, %v5814_v1  ;;  %v3364_v44 = vmul.f32 %v3332_v58, %v3332_v58 }
 0x22a   : > { %v3405_v39 = vsel %vm3215_vm7, %v3362_v28, 0.0  ;;  %v3335_v19 = vsub.f32 %v5713_v29, %v5814_v1  ;;  %v3365_v46 = vmul.f32 %v3333_v50, %v3333_v50  ;;  %v3407_v42 = vsel %vm3215_vm7, %v3363_v21, 0.0 }
 0x22b   : > { %v3392_v9 = vadd.f32 %v3391_v52, %v3390_v32  ;;  %v3336_v25 = vsub.f32 %v5697_v6, %v5814_v1  ;;  %v3366_v38 = vmul.f32 %v3334_v13, %v3334_v13  ;;  %v3409_v57 = vsel %vm3215_vm7, %v3364_v44, 0.0 }
 0x22c   : > { %v3337_v17 = vsub.f32 %v5706_v15, %v5814_v1  ;;  %v3367_v22 = vmul.f32 %v3335_v19, %v3335_v19  ;;  %v3411_v48 = vsel %vm3215_vm7, %v3365_v46, 0.0  ;;  %v3338_v29 = vsub.f32 %v5729_v51, %v5814_v1 }
 0x22d   : > { %v3394_v4 = vadd.f32 %v3393_v35, %v3392_v9  ;;  %v3368_v8 = vmul.f32 %v3336_v25, %v3336_v25  ;;  %v3413_v12 = vsel %vm3215_vm7, %v3366_v38, 0.0  ;;  %v3339_v6 = vsub.f32 %v5741_v3, %v5814_v1 }
 0x22e   : > { %v3369_v55 = vmul.f32 %v3337_v17, %v3337_v17  ;;  %v3415_v16 = vsel %vm3215_vm7, %v3367_v22, 0.0  ;;  %v3340_v15 = vsub.f32 %v5725_v33, %v5814_v1  ;;  %v3370_v9 = vmul.f32 %v3338_v29, %v3338_v29 }
 0x22f   : > { %v3396_v7 = vadd.f32 %v3395_v23, %v3394_v4  ;;  %v3417_v47 = vsel %vm3215_vm7, %v3368_v8, 0.0  ;;  %v3341_v51 = vsub.f32 %v5734_v11, %v5814_v1  ;;  %v3371_v35 = vmul.f32 %v3339_v6, %v3339_v6 }
 0x230   : > { %v3419_v4 = vsel %vm3215_vm7, %v3369_v55, 0.0  ;;  %v3342_v3 = vsub.f32 %v5757_v30, %v5814_v1  ;;  %v3372_v53 = vmul.f32 %v3340_v15, %v3340_v15  ;;  %v3421_v23 = vsel %vm3215_vm7, %v3370_v9, 0.0 }
 0x231   : > { %v3398_v18 = vadd.f32 %v3397_v10, %v3396_v7  ;;  %v3343_v33 = vsub.f32 %v5769_v37, %v5814_v1  ;;  %v3373_v24 = vmul.f32 %v3341_v51, %v3341_v51  ;;  %v3423_v59 = vsel %vm3215_vm7, %v3371_v35, 0.0 }
 0x232   : > { %v3344_v11 = vsub.f32 %v5753_v62, %v5814_v1  ;;  %v3425_v31 = vsel %vm3215_vm7, %v3372_v53, 0.0  ;;  %v3345_v30 = vsub.f32 %v5762_v54, %v5814_v1  ;;  %v3346_v37 = vsub.f32 %v5785_v20, %v5814_v1 }
 0x233   : > { %v3400_v0 = vadd.f32 %v3399_v34, %v3398_v18  ;;  %v3374_v18 = vmul.f32 %v3342_v3, %v3342_v3  ;;  %v3375_v34 = vmul.f32 %v3343_v33, %v3343_v33  ;;  %v3347_v62 = vsub.f32 %v5797_v61, %v5814_v1 }
 0x234   : > { %v3376_v28 = vmul.f32 %v3344_v11, %v3344_v11  ;;  %v3377_v50 = vmul.f32 %v3345_v30, %v3345_v30  ;;  %v3348_v54 = vsub.f32 %v5781_v56, %v5814_v1  ;;  %v3349_v20 = vsub.f32 %v5790_v27, %v5814_v1 }
 0x235   : > { %v3402_v36 = vadd.f32 %v3401_v41, %v3400_v0  ;;  %v3427_v0 = vsel %vm3215_vm7, %v3373_v24, 0.0  ;;  %v3429_v41 = vsel %vm3215_vm7, %v3374_v18, 0.0  ;;  %v3431_v21 = vsel %vm3215_vm7, %v3375_v34, 0.0 }
 0x236   : > { %v3433_v13 = vsel %vm3215_vm7, %v3376_v28, 0.0  ;;  %v3380_v61 = vmul.f32 %v3348_v54, %v3348_v54 }
 0x237   : > { %v3404_v43 = vadd.f32 %v3403_v14, %v3402_v36 }
 0x238   : > { %v3441_v38 = vsel %vm3215_vm7, %v3380_v61, 0.0 }
 0x239   : > { %v3406_v45 = vadd.f32 %v3405_v39, %v3404_v43  ;;  %v3378_v43 = vmul.f32 %v3346_v37, %v3346_v37  ;;  %v3379_v39 = vmul.f32 %v3347_v62, %v3347_v62 }
 0x23b   : > { %v3408_v49 = vadd.f32 %v3407_v42, %v3406_v45  ;;  %v3435_v45 = vsel %vm3215_vm7, %v3377_v50, 0.0  ;;  %v3437_v46 = vsel %vm3215_vm7, %v3378_v43, 0.0  ;;  %v3439_v25 = vsel %vm3215_vm7, %v3379_v39, 0.0 }
 0x23d   : > { %v3410_v40 = vadd.f32 %v3409_v57, %v3408_v49  ;;  %v3381_v49 = vmul.f32 %v3349_v20, %v3349_v20 }
 0x23f   : > { %v3412_v26 = vadd.f32 %v3411_v48, %v3410_v40  ;;  %v3443_v40 = vsel %vm3215_vm7, %v3381_v49, 0.0 }
 0x241   : > { %v3414_v32 = vadd.f32 %v3413_v12, %v3412_v26 }
 0x243   : > { %v3416_v52 = vadd.f32 %v3415_v16, %v3414_v32 }
 0x245   : > { %v3418_v5 = vadd.f32 %v3417_v47, %v3416_v52 }
 0x247   : > { %v3420_v60 = vadd.f32 %v3419_v4, %v3418_v5 }
 0x249   : > { %v3422_v7 = vadd.f32 %v3421_v23, %v3420_v60 }
 0x24b   : > { %v3424_v10 = vadd.f32 %v3423_v59, %v3422_v7 }
 0x24d   : > { %v3426_v63 = vadd.f32 %v3425_v31, %v3424_v10 }
 0x24f   : > { %v3428_v58 = vadd.f32 %v3427_v0, %v3426_v63 }
 0x251   : > { %v3430_v36 = vadd.f32 %v3429_v41, %v3428_v58 }
 0x253   : > { %v3432_v14 = vadd.f32 %v3431_v21, %v3430_v36 }
 0x255   : > { %v3434_v44 = vadd.f32 %v3433_v13, %v3432_v14 }
 0x257   : > { %v3436_v19 = vadd.f32 %v3435_v45, %v3434_v44 }
 0x259   : > { %v3438_v42 = vadd.f32 %v3437_v46, %v3436_v19 }
 0x25b   : > { %v3440_v56 = vadd.f32 %v3439_v25, %v3438_v42 }
 0x25d   : > { %v3442_v57 = vadd.f32 %v3441_v38, %v3440_v56 }
 0x25f   : > { %v3444_v17 = vadd.f32 %v3443_v40, %v3442_v57 }
 0x261   : > { %v3445_v27 = vrot.slane %v3444_v17, 4 }
 0x263   : > { %v3446_v1 = vadd.f32 %v3445_v27, %v3444_v17 }
 0x265   : > { %v3447_v22 = vrot.slane %v3446_v1, 2 }
 0x267   : > { %v3448_v48 = vadd.f32 %v3447_v22, %v3446_v1 }
 0x269   : > { %v3449_v26 = vrot.slane %v3448_v48, 1 }
 0x26b   : > { %v3450_v29 = vadd.f32 %v3449_v26, %v3448_v48 }
 0x26d   : > { %v3452_v8 = vsel %vm3451_vm15, %v5811_v2, %v3450_v29 }
 0x26e   : > { %3454 = vst.msk [vmem:[%s181_s18] sm:$0x3] %vm3453_vm1, %v3452_v8 }
 0x26f PF: > { %s14_s12 = sadd.s32 1, %s4447_s12  }
 0x270   : > { %p11_p4 = scmp.ge.s32.totalorder %s14_s12, 4  }
 0x272   :  { %13 = sbr.rel (!%p11_p4) target bundleno = 1 (0x1), region = 78 }

</bundles_post_ra>
